<compile_context>
chip_gen: v5e
topology: v5e:2x2
jax: 0.10.0
libtpu: 0.0.40
codegen_flags: <defaults>
</compile_context>

<pallas_src>
import functools

import numpy as np
import jax
import jax.numpy as jnp
from jax.experimental import pallas as pl
from jax.experimental.pallas import tpu as pltpu


def _round_up(x, m):
    return ((x + m - 1) // m) * m


# ---------------------------------------------------------------------------
# Fused kernel: conv1+ReLU+pool1 -> conv2+ReLU+pool2 -> fc1+ReLU(+Dropout=id) -> fc2
# One grid step == one batch row.
# ---------------------------------------------------------------------------
def _cnn1d_fused_kernel(x_ref, hl_ref, w1_ref, b1_ref, w2_ref, b2_ref,
                        w1a_ref, w1b_ref, fb1_ref, wo_ref, bo_ref, o_ref,
                        y_ref, *, RU, L1, P1, PW1, PAD2, K2, C1, L2, P2, PW2):
    f32, bf16 = jnp.float32, jnp.bfloat16

    # ---- stage 1: Conv1d(4->128, k=6, pad=2) + ReLU -------------------------------
    # x_ref is im2col'd: row p / col (t*Cin+ci) = seq[ci, p + t - 3], i.e. the conv
    # input for padded-pool row p, tap t.  One K=24 dot replaces 6 K=8 tap dots.
    a = jnp.dot(x_ref[0, 0:RU, :], w1_ref[...], preferred_element_type=f32)
    y_ref[0:RU, :] = jnp.maximum(a + b1_ref[...], 0.0)

    # MaxPool1d(30, stride=30, padding=1) pad rows: row 0 (left pad) and any used
    # row > L1 (right pad).  Values are post-ReLU (>= 0), so zeroing pad rows is
    # equivalent to PyTorch's -inf padding.  Tiny explicit stores, no iota/where.
    y_ref[0:1, :] = jnp.zeros((1, C1), f32)
    if RU - 1 > L1:
        y_ref[L1 + 1:RU, :] = jnp.zeros((RU - 1 - L1, C1), f32)

    # ---- pool1: running max over strided row slices (window j = rows j*30..j*30+29)
    m = y_ref[pl.ds(0, P1, stride=PW1), :]
    for t in range(1, PW1):
        m = jnp.maximum(m, y_ref[pl.ds(t, P1, stride=PW1), :])      # (P1, C1) f32

    # ---- stage 2: Conv1d(128->32, k=9, pad=4) + ReLU + MaxPool1d(10) --------------
    # Taps folded into one contraction: lane-concat the 9 shifted slices of the
    # zero-padded pool1 value -> (L2, K2*C1), one bf16 cast, one dot.
    zpad = jnp.zeros((PAD2, C1), f32)
    xfull = jnp.concatenate([zpad, m, zpad], axis=0)                # (P1+2*PAD2, C1)
    x2 = jnp.concatenate([xfull[t:t + L2, :] for t in range(K2)],
                         axis=1).astype(bf16)                       # (L2, K2*C1)
    a2 = jnp.dot(x2, w2_ref[...], preferred_element_type=f32)       # (L2, C2)
    a2 = jnp.maximum(a2 + b2_ref[...], 0.0)
    p2 = [jnp.max(a2[j * PW2:(j + 1) * PW2, :], axis=0, keepdims=True)
          for j in range(P2)]                                       # P2 x (1, C2)

    # ---- stage 3: Linear(fc_in,64) + ReLU (+Dropout=identity) + Linear(64,num_ct) -
    # NCL flatten + hl concat are folded into the weight layout (w1a / w1b).
    h = jnp.dot(hl_ref[0].astype(bf16), w1b_ref[...], preferred_element_type=f32)
    for j in range(P2):
        h = h + jnp.dot(p2[j].astype(bf16), w1a_ref[j],
                        preferred_element_type=f32)
    h = jnp.maximum(h + fb1_ref[...], 0.0)
    # TODO(synk): Dropout(p=0.00099) is identity at inference; training-mode dropout
    #             (stateful PRNG mask) is not implemented.
    o_ref[0] = jnp.dot(h.astype(bf16), wo_ref[...],
                       preferred_element_type=f32) + bo_ref[...]


# ---------------------------------------------------------------------------
# Forward pass
# ---------------------------------------------------------------------------
def cnn1d_forward(params, seq, hl):
    f32, bf16 = jnp.float32, jnp.bfloat16
    B, Cin, L = seq.shape
    nhl = hl.shape[1]
    assert nhl <= 8

    w1, b1 = params["conv1_w"], params["conv1_b"]          # (128, 4, 6), (128,)
    w2, b2 = params["conv2_w"], params["conv2_b"]          # (32, 128, 9), (32,)
    fw1, fb1 = params["fc1_w"], params["fc1_b"]            # (64, fc_in), (64,)
    fw2, fb2 = params["fc2_w"], params["fc2_b"]            # (num_ct, 64), (num_ct,)

    C1, _, K1 = w1.shape
    C2, _, K2 = w2.shape
    PAD1, PAD2 = 2, 4
    PW1, PW2 = 30, 10
    H = fw1.shape[0]
    NC = fw2.shape[0]

    L1 = L + 2 * PAD1 - K1 + 1                 # conv1 output length
    P1 = (L1 + 2 - PW1) // PW1 + 1             # pool1 output length (pool padding=1)
    L2 = P1 + 2 * PAD2 - K2 + 1                # conv2 output length
    P2 = (L2 - PW2) // PW2 + 1                 # pool2 output length
    assert fw1.shape[1] == P2 * C2 + nhl, "fc_in mismatch"

    RU = P1 * PW1                              # padded-pool rows actually pooled
    ROWS = _round_up(RU, 8)
    KC1 = K1 * Cin

    # ---- im2col for conv1 (host side): row p / feature (t*Cin+ci) = seq[ci, p+t-3];
    #      pre-cast to bf16 so the kernel input is lane-dense. ----------------------
    lpad = PAD1 + 1                            # conv pad + pool pad
    xt = jnp.transpose(seq.astype(f32), (0, 2, 1))                  # (B, L, Cin)
    xp = jnp.pad(xt, ((0, 0), (lpad, PW1 + K1), (0, 0)))            # generous right pad
    xcol = jnp.concatenate([xp[:, t:t + ROWS, :] for t in range(K1)],
                           axis=-1).astype(bf16)                    # (B, ROWS, KC1)

    # ---- weight prep (tiny, once per call) -----------------------------------------
    w1cat = jnp.transpose(w1, (2, 1, 0)).reshape(KC1, C1).astype(bf16)      # (KC1, C1)
    b1r = b1.reshape(1, C1).astype(f32)
    w2cat = jnp.transpose(w2, (2, 1, 0)).reshape(K2 * C1, C2).astype(bf16)  # (K2*C1, C2)
    b2r = b2.reshape(1, C2).astype(f32)

    W1t = jnp.transpose(fw1, (1, 0))                                        # (fc_in, H)
    # torch Flatten is NCL: feature index = c * P2 + j -> permute so the kernel can
    # consume pool2 in (position, channel) order; hl rows kept separate (no concat).
    w1a = jnp.transpose(W1t[:P2 * C2].reshape(C2, P2, H), (1, 0, 2)).astype(bf16)
    w1b = jnp.pad(W1t[P2 * C2:], ((0, 8 - nhl), (0, 0))).astype(bf16)       # (8, H)
    fb1r = fb1.reshape(1, H).astype(f32)
    W2t = jnp.transpose(fw2, (1, 0)).astype(bf16)                           # (H, NC)
    fb2r = fb2.reshape(1, NC).astype(f32)

    hl3 = jnp.pad(hl.astype(f32), ((0, 0), (0, 8 - nhl))).reshape(B, 1, 8)

    kernel = functools.partial(
        _cnn1d_fused_kernel, RU=RU, L1=L1, P1=P1, PW1=PW1, PAD2=PAD2, K2=K2,
        C1=C1, L2=L2, P2=P2, PW2=PW2)

    flops = B * (2 * RU * KC1 * C1 + 2 * L2 * K2 * C1 * C2
                 + 2 * (P2 * C2 + 8) * H + 2 * H * NC)
    bytes_accessed = (B * (ROWS * KC1 * 2 + 8 * 4 + NC * 4)
                      + 2 * (KC1 * C1 + K2 * C1 * C2 + P2 * C2 * H + 8 * H + H * NC)
                      + 4 * (C1 + C2 + H + NC))

    out = pl.pallas_call(
        kernel,
        out_shape=jax.ShapeDtypeStruct((B, 1, NC), f32),
        grid=(B,),
        in_specs=[
            pl.BlockSpec((1, ROWS, KC1), lambda b: (b, 0, 0)),     # im2col input
            pl.BlockSpec((1, 1, 8), lambda b: (b, 0, 0)),          # hl features
            pl.BlockSpec((KC1, C1), lambda b: (0, 0)),             # conv1 weights
            pl.BlockSpec((1, C1), lambda b: (0, 0)),               # conv1 bias
            pl.BlockSpec((K2 * C1, C2), lambda b: (0, 0)),         # conv2 weights
            pl.BlockSpec((1, C2), lambda b: (0, 0)),               # conv2 bias
            pl.BlockSpec((P2, C2, H), lambda b: (0, 0, 0)),        # fc1 (conv part)
            pl.BlockSpec((8, H), lambda b: (0, 0)),                # fc1 (hl part)
            pl.BlockSpec((1, H), lambda b: (0, 0)),                # fc1 bias
            pl.BlockSpec((H, NC), lambda b: (0, 0)),               # fc2 weights
            pl.BlockSpec((1, NC), lambda b: (0, 0)),               # fc2 bias
        ],
        out_specs=pl.BlockSpec((1, 1, NC), lambda b: (b, 0, 0)),
        scratch_shapes=[pltpu.VMEM((ROWS, C1), f32)],              # conv1+ReLU rows
        compiler_params=pltpu.CompilerParams(dimension_semantics=("parallel",)),
        cost_estimate=pl.CostEstimate(flops=flops, transcendentals=0,
                                      bytes_accessed=bytes_accessed),
    )(xcol, hl3, w1cat, b1r, w2cat, b2r, w1a, w1b, fb1r, W2t, fb2r)
    return out[:, 0, :]


# ---------------------------------------------------------------------------
# Pure-JAX f32 reference (matches the PyTorch module) for a sanity check.
# ---------------------------------------------------------------------------
def cnn1d_reference(params, seq, hl):
    f32 = jnp.float32
    hi = jax.lax.Precision.HIGHEST
    x = seq.astype(f32)
    y = jax.lax.conv_general_dilated(
        x, params["conv1_w"].astype(f32), window_strides=(1,), padding=[(2, 2)],
        dimension_numbers=("NCH", "OIH", "NCH"), precision=hi)
    y = jax.nn.relu(y + params["conv1_b"][None, :, None])
    y = jax.lax.reduce_window(y, -jnp.inf, jax.lax.max, (1, 1, 30), (1, 1, 30),
                              [(0, 0), (0, 0), (1, 1)])
    y = jax.lax.conv_general_dilated(
        y, params["conv2_w"].astype(f32), window_strides=(1,), padding=[(4, 4)],
        dimension_numbers=("NCH", "OIH", "NCH"), precision=hi)
    y = jax.nn.relu(y + params["conv2_b"][None, :, None])
    y = jax.lax.reduce_window(y, -jnp.inf, jax.lax.max, (1, 1, 10), (1, 1, 10),
                              [(0, 0), (0, 0), (0, 0)])
    x1 = y.reshape(y.shape[0], -1)                        # NCL flatten
    xcat = jnp.concatenate([x1, hl.astype(f32)], axis=1)
    h = jax.nn.relu(jnp.dot(xcat, params["fc1_w"].T, precision=hi) + params["fc1_b"])
    return jnp.dot(h, params["fc2_w"].T, precision=hi) + params["fc2_b"]


# ---------------------------------------------------------------------------
# Deterministic synthetic parameters (shapes from CNN1D.__init__)
# ---------------------------------------------------------------------------
def init_params(key, num_ct, upstream, downstream):
    l = upstream + downstream
    l = np.floor((l - 6 + 4) / 1) + 1
    l = np.floor((l - 30 + 2) / 30) + 1
    l = np.floor((l - 9 + 8) / 1) + 1
    l = np.floor((l - 10) / 10) + 1
    fc_in = int(l * 32 + 5)

    ks = jax.random.split(key, 8)
    p = {
        "conv1_w": 0.05 * jax.random.normal(ks[0], (128, 4, 6), jnp.float32),
        "conv1_b": 0.05 * jax.random.normal(ks[1], (128,), jnp.float32),
        "conv2_w": 0.05 * jax.random.normal(ks[2], (32, 128, 9), jnp.float32),
        "conv2_b": 0.05 * jax.random.normal(ks[3], (32,), jnp.float32),
        "fc1_w": 0.05 * jax.random.normal(ks[4], (64, fc_in), jnp.float32),
        "fc1_b": 0.05 * jax.random.normal(ks[5], (64,), jnp.float32),
        "fc2_w": 0.05 * jax.random.normal(ks[6], (num_ct, 64), jnp.float32),
        "fc2_b": 0.05 * jax.random.normal(ks[7], (num_ct,), jnp.float32),
    }
    return p, fc_in


if __name__ == "__main__":
    # Small shapes consistent with the module's math: L = upstream + downstream.
    B, num_ct = 2, 7
    upstream, downstream = 600, 300
    L = upstream + downstream                     # 900

    key = jax.random.PRNGKey(0)
    kp, ks, kh = jax.random.split(key, 3)
    params, fc_in = init_params(kp, num_ct, upstream, downstream)

    seq = jax.random.normal(ks, (B, 4, L), jnp.float32)   # NCL, like torch Conv1d
    hl = jax.random.normal(kh, (B, 5), jnp.float32)

    fwd = jax.jit(functools.partial(cnn1d_forward, params))
    out = fwd(seq, hl)
    jax.block_until_ready(out)

    assert out.shape == (B, num_ct), out.shape
    assert bool(jnp.all(jnp.isfinite(out)))

    ref = cnn1d_reference(params, seq, hl)
    err = float(jnp.max(jnp.abs(out - ref)))
    assert err < 1e-1, f"mismatch vs f32 reference: max abs err = {err}"
    print("KERNEL_OK")
</pallas_src>

<mosaic_0001>
module attributes {stable_mosaic.version = 11 : i64} {
  func.func @_cnn1d_fused_kernel(%arg0: i32, %arg1: memref<1x904x24xbf16, #tpu.memory_space<vmem>>, %arg2: memref<1x1x8xf32, #tpu.memory_space<vmem>>, %arg3: memref<24x128xbf16, #tpu.memory_space<vmem>>, %arg4: memref<1x128xf32, #tpu.memory_space<vmem>>, %arg5: memref<1152x32xbf16, #tpu.memory_space<vmem>>, %arg6: memref<1x32xf32, #tpu.memory_space<vmem>>, %arg7: memref<3x32x64xbf16, #tpu.memory_space<vmem>>, %arg8: memref<8x64xbf16, #tpu.memory_space<vmem>>, %arg9: memref<1x64xf32, #tpu.memory_space<vmem>>, %arg10: memref<64x7xbf16, #tpu.memory_space<vmem>>, %arg11: memref<1x7xf32, #tpu.memory_space<vmem>>, %arg12: memref<1x1x7xf32, #tpu.memory_space<vmem>>, %arg13: memref<904x128xf32, #tpu.memory_space<vmem>>) attributes {dimension_semantics = [#tpu.dimension_semantics<parallel>], iteration_bounds = array<i64: 2>, scalar_prefetch = 0 : i64, scratch_operands = 1 : i64, tpu.core_type = #tpu.core_type<tc>, window_params = [{transform_indices = @transform_0, window_bounds = array<i64: 1, 904, 24>}, {transform_indices = @transform_1, window_bounds = array<i64: 1, 1, 8>}, {pipeline_mode = #tpu.pipeline_mode<synchronous>, transform_indices = @transform_2, window_bounds = array<i64: 24, 128>}, {pipeline_mode = #tpu.pipeline_mode<synchronous>, transform_indices = @transform_3, window_bounds = array<i64: 1, 128>}, {pipeline_mode = #tpu.pipeline_mode<synchronous>, transform_indices = @transform_4, window_bounds = array<i64: 1152, 32>}, {pipeline_mode = #tpu.pipeline_mode<synchronous>, transform_indices = @transform_5, window_bounds = array<i64: 1, 32>}, {pipeline_mode = #tpu.pipeline_mode<synchronous>, transform_indices = @transform_6, window_bounds = array<i64: 3, 32, 64>}, {pipeline_mode = #tpu.pipeline_mode<synchronous>, transform_indices = @transform_7, window_bounds = array<i64: 8, 64>}, {pipeline_mode = #tpu.pipeline_mode<synchronous>, transform_indices = @transform_8, window_bounds = array<i64: 1, 64>}, {pipeline_mode = #tpu.pipeline_mode<synchronous>, transform_indices = @transform_9, window_bounds = array<i64: 64, 7>}, {pipeline_mode = #tpu.pipeline_mode<synchronous>, transform_indices = @transform_10, window_bounds = array<i64: 1, 7>}, {transform_indices = @transform_11, window_bounds = array<i64: 1, 1, 7>}]} {
    %c0 = arith.constant 0 : index
    %c0_0 = arith.constant 0 : index
    %c0_1 = arith.constant 0 : index
    %0 = vector.load %arg1[%c0, %c0_0, %c0_1] : memref<1x904x24xbf16, #tpu.memory_space<vmem>>, vector<1x900x24xbf16>
    %1 = vector.shape_cast %0 : vector<1x900x24xbf16> to vector<900x24xbf16>
    %c0_2 = arith.constant 0 : index
    %c0_3 = arith.constant 0 : index
    %2 = vector.load %arg3[%c0_2, %c0_3] : memref<24x128xbf16, #tpu.memory_space<vmem>>, vector<24x128xbf16>
    %cst = arith.constant dense<0.000000e+00> : vector<900x128xf32>
    %3 = tpu.matmul %1, %2, %cst {dimension_numbers = #tpu.dot_dimension_numbers<[1], [0], [0], [1], [0, 0, 1, 1], [], []>} : vector<900x24xbf16>, vector<24x128xbf16>, vector<900x128xf32> -> vector<900x128xf32>
    %c0_4 = arith.constant 0 : index
    %c0_5 = arith.constant 0 : index
    %4 = vector.load %arg4[%c0_4, %c0_5] : memref<1x128xf32, #tpu.memory_space<vmem>>, vector<1x128xf32>
    %5 = vector.broadcast %4 : vector<1x128xf32> to vector<900x128xf32>
    %6 = arith.addf %3, %5 : vector<900x128xf32>
    %cst_6 = arith.constant 0.000000e+00 : f32
    %7 = vector.broadcast %cst_6 : f32 to vector<900x128xf32>
    %8 = arith.maximumf %6, %7 : vector<900x128xf32>
    %c0_7 = arith.constant 0 : index
    %c0_8 = arith.constant 0 : index
    %9 = vector.load %arg13[%c0_7, %c0_8] : memref<904x128xf32, #tpu.memory_space<vmem>>, vector<900x128xf32>
    tpu.vector_store %arg13[%c0_7, %c0_8], %8 {strides = array<i32>} : memref<904x128xf32, #tpu.memory_space<vmem>>, vector<900x128xf32>,
    %cst_9 = arith.constant 0.000000e+00 : f32
    %10 = vector.broadcast %cst_9 : f32 to vector<1x128xf32>
    %c0_10 = arith.constant 0 : index
    %c0_11 = arith.constant 0 : index
    %11 = vector.load %arg13[%c0_10, %c0_11] : memref<904x128xf32, #tpu.memory_space<vmem>>, vector<1x128xf32>
    tpu.vector_store %arg13[%c0_10, %c0_11], %10 {strides = array<i32>} : memref<904x128xf32, #tpu.memory_space<vmem>>, vector<1x128xf32>,
    %c0_12 = arith.constant 0 : index
    %c0_13 = arith.constant 0 : index
    %12 = tpu.strided_load %arg13[%c0_12, %c0_13] {strides = array<i32: 30, 1>} : memref<904x128xf32, #tpu.memory_space<vmem>>, vector<30x128xf32>
    %c1 = arith.constant 1 : index
    %c0_14 = arith.constant 0 : index
    %13 = tpu.strided_load %arg13[%c1, %c0_14] {strides = array<i32: 30, 1>} : memref<904x128xf32, #tpu.memory_space<vmem>>, vector<30x128xf32>
    %14 = arith.maximumf %12, %13 : vector<30x128xf32>
    %c2 = arith.constant 2 : index
    %c0_15 = arith.constant 0 : index
    %15 = tpu.strided_load %arg13[%c2, %c0_15] {strides = array<i32: 30, 1>} : memref<904x128xf32, #tpu.memory_space<vmem>>, vector<30x128xf32>
    %16 = arith.maximumf %14, %15 : vector<30x128xf32>
    %c3 = arith.constant 3 : index
    %c0_16 = arith.constant 0 : index
    %17 = tpu.strided_load %arg13[%c3, %c0_16] {strides = array<i32: 30, 1>} : memref<904x128xf32, #tpu.memory_space<vmem>>, vector<30x128xf32>
    %18 = arith.maximumf %16, %17 : vector<30x128xf32>
    %c4 = arith.constant 4 : index
    %c0_17 = arith.constant 0 : index
    %19 = tpu.strided_load %arg13[%c4, %c0_17] {strides = array<i32: 30, 1>} : memref<904x128xf32, #tpu.memory_space<vmem>>, vector<30x128xf32>
    %20 = arith.maximumf %18, %19 : vector<30x128xf32>
    %c5 = arith.constant 5 : index
    %c0_18 = arith.constant 0 : index
    %21 = tpu.strided_load %arg13[%c5, %c0_18] {strides = array<i32: 30, 1>} : memref<904x128xf32, #tpu.memory_space<vmem>>, vector<30x128xf32>
    %22 = arith.maximumf %20, %21 : vector<30x128xf32>
    %c6 = arith.constant 6 : index
    %c0_19 = arith.constant 0 : index
    %23 = tpu.strided_load %arg13[%c6, %c0_19] {strides = array<i32: 30, 1>} : memref<904x128xf32, #tpu.memory_space<vmem>>, vector<30x128xf32>
    %24 = arith.maximumf %22, %23 : vector<30x128xf32>
    %c7 = arith.constant 7 : index
    %c0_20 = arith.constant 0 : index
    %25 = tpu.strided_load %arg13[%c7, %c0_20] {strides = array<i32: 30, 1>} : memref<904x128xf32, #tpu.memory_space<vmem>>, vector<30x128xf32>
    %26 = arith.maximumf %24, %25 : vector<30x128xf32>
    %c8 = arith.constant 8 : index
    %c0_21 = arith.constant 0 : index
    %27 = tpu.strided_load %arg13[%c8, %c0_21] {strides = array<i32: 30, 1>} : memref<904x128xf32, #tpu.memory_space<vmem>>, vector<30x128xf32>
    %28 = arith.maximumf %26, %27 : vector<30x128xf32>
    %c9 = arith.constant 9 : index
    %c0_22 = arith.constant 0 : index
    %29 = tpu.strided_load %arg13[%c9, %c0_22] {strides = array<i32: 30, 1>} : memref<904x128xf32, #tpu.memory_space<vmem>>, vector<30x128xf32>
    %30 = arith.maximumf %28, %29 : vector<30x128xf32>
    %c10 = arith.constant 10 : index
    %c0_23 = arith.constant 0 : index
    %31 = tpu.strided_load %arg13[%c10, %c0_23] {strides = array<i32: 30, 1>} : memref<904x128xf32, #tpu.memory_space<vmem>>, vector<30x128xf32>
    %32 = arith.maximumf %30, %31 : vector<30x128xf32>
    %c11 = arith.constant 11 : index
    %c0_24 = arith.constant 0 : index
    %33 = tpu.strided_load %arg13[%c11, %c0_24] {strides = array<i32: 30, 1>} : memref<904x128xf32, #tpu.memory_space<vmem>>, vector<30x128xf32>
    %34 = arith.maximumf %32, %33 : vector<30x128xf32>
    %c12 = arith.constant 12 : index
    %c0_25 = arith.constant 0 : index
    %35 = tpu.strided_load %arg13[%c12, %c0_25] {strides = array<i32: 30, 1>} : memref<904x128xf32, #tpu.memory_space<vmem>>, vector<30x128xf32>
    %36 = arith.maximumf %34, %35 : vector<30x128xf32>
    %c13 = arith.constant 13 : index
    %c0_26 = arith.constant 0 : index
    %37 = tpu.strided_load %arg13[%c13, %c0_26] {strides = array<i32: 30, 1>} : memref<904x128xf32, #tpu.memory_space<vmem>>, vector<30x128xf32>
    %38 = arith.maximumf %36, %37 : vector<30x128xf32>
    %c14 = arith.constant 14 : index
    %c0_27 = arith.constant 0 : index
    %39 = tpu.strided_load %arg13[%c14, %c0_27] {strides = array<i32: 30, 1>} : memref<904x128xf32, #tpu.memory_space<vmem>>, vector<30x128xf32>
    %40 = arith.maximumf %38, %39 : vector<30x128xf32>
    %c15 = arith.constant 15 : index
    %c0_28 = arith.constant 0 : index
    %41 = tpu.strided_load %arg13[%c15, %c0_28] {strides = array<i32: 30, 1>} : memref<904x128xf32, #tpu.memory_space<vmem>>, vector<30x128xf32>
    %42 = arith.maximumf %40, %41 : vector<30x128xf32>
    %c16 = arith.constant 16 : index
    %c0_29 = arith.constant 0 : index
    %43 = tpu.strided_load %arg13[%c16, %c0_29] {strides = array<i32: 30, 1>} : memref<904x128xf32, #tpu.memory_space<vmem>>, vector<30x128xf32>
    %44 = arith.maximumf %42, %43 : vector<30x128xf32>
    %c17 = arith.constant 17 : index
    %c0_30 = arith.constant 0 : index
    %45 = tpu.strided_load %arg13[%c17, %c0_30] {strides = array<i32: 30, 1>} : memref<904x128xf32, #tpu.memory_space<vmem>>, vector<30x128xf32>
    %46 = arith.maximumf %44, %45 : vector<30x128xf32>
    %c18 = arith.constant 18 : index
    %c0_31 = arith.constant 0 : index
    %47 = tpu.strided_load %arg13[%c18, %c0_31] {strides = array<i32: 30, 1>} : memref<904x128xf32, #tpu.memory_space<vmem>>, vector<30x128xf32>
    %48 = arith.maximumf %46, %47 : vector<30x128xf32>
    %c19 = arith.constant 19 : index
    %c0_32 = arith.constant 0 : index
    %49 = tpu.strided_load %arg13[%c19, %c0_32] {strides = array<i32: 30, 1>} : memref<904x128xf32, #tpu.memory_space<vmem>>, vector<30x128xf32>
    %50 = arith.maximumf %48, %49 : vector<30x128xf32>
    %c20 = arith.constant 20 : index
    %c0_33 = arith.constant 0 : index
    %51 = tpu.strided_load %arg13[%c20, %c0_33] {strides = array<i32: 30, 1>} : memref<904x128xf32, #tpu.memory_space<vmem>>, vector<30x128xf32>
    %52 = arith.maximumf %50, %51 : vector<30x128xf32>
    %c21 = arith.constant 21 : index
    %c0_34 = arith.constant 0 : index
    %53 = tpu.strided_load %arg13[%c21, %c0_34] {strides = array<i32: 30, 1>} : memref<904x128xf32, #tpu.memory_space<vmem>>, vector<30x128xf32>
    %54 = arith.maximumf %52, %53 : vector<30x128xf32>
    %c22 = arith.constant 22 : index
    %c0_35 = arith.constant 0 : index
    %55 = tpu.strided_load %arg13[%c22, %c0_35] {strides = array<i32: 30, 1>} : memref<904x128xf32, #tpu.memory_space<vmem>>, vector<30x128xf32>
    %56 = arith.maximumf %54, %55 : vector<30x128xf32>
    %c23 = arith.constant 23 : index
    %c0_36 = arith.constant 0 : index
    %57 = tpu.strided_load %arg13[%c23, %c0_36] {strides = array<i32: 30, 1>} : memref<904x128xf32, #tpu.memory_space<vmem>>, vector<30x128xf32>
    %58 = arith.maximumf %56, %57 : vector<30x128xf32>
    %c24 = arith.constant 24 : index
    %c0_37 = arith.constant 0 : index
    %59 = tpu.strided_load %arg13[%c24, %c0_37] {strides = array<i32: 30, 1>} : memref<904x128xf32, #tpu.memory_space<vmem>>, vector<30x128xf32>
    %60 = arith.maximumf %58, %59 : vector<30x128xf32>
    %c25 = arith.constant 25 : index
    %c0_38 = arith.constant 0 : index
    %61 = tpu.strided_load %arg13[%c25, %c0_38] {strides = array<i32: 30, 1>} : memref<904x128xf32, #tpu.memory_space<vmem>>, vector<30x128xf32>
    %62 = arith.maximumf %60, %61 : vector<30x128xf32>
    %c26 = arith.constant 26 : index
    %c0_39 = arith.constant 0 : index
    %63 = tpu.strided_load %arg13[%c26, %c0_39] {strides = array<i32: 30, 1>} : memref<904x128xf32, #tpu.memory_space<vmem>>, vector<30x128xf32>
    %64 = arith.maximumf %62, %63 : vector<30x128xf32>
    %c27 = arith.constant 27 : index
    %c0_40 = arith.constant 0 : index
    %65 = tpu.strided_load %arg13[%c27, %c0_40] {strides = array<i32: 30, 1>} : memref<904x128xf32, #tpu.memory_space<vmem>>, vector<30x128xf32>
    %66 = arith.maximumf %64, %65 : vector<30x128xf32>
    %c28 = arith.constant 28 : index
    %c0_41 = arith.constant 0 : index
    %67 = tpu.strided_load %arg13[%c28, %c0_41] {strides = array<i32: 30, 1>} : memref<904x128xf32, #tpu.memory_space<vmem>>, vector<30x128xf32>
    %68 = arith.maximumf %66, %67 : vector<30x128xf32>
    %c29 = arith.constant 29 : index
    %c0_42 = arith.constant 0 : index
    %69 = tpu.strided_load %arg13[%c29, %c0_42] {strides = array<i32: 30, 1>} : memref<904x128xf32, #tpu.memory_space<vmem>>, vector<30x128xf32>
    %70 = arith.maximumf %68, %69 : vector<30x128xf32>
    %cst_43 = arith.constant 0.000000e+00 : f32
    %71 = vector.broadcast %cst_43 : f32 to vector<4x128xf32>
    %72 = tpu.concatenate %71, %70, %71 in 0 : vector<4x128xf32>, vector<30x128xf32>, vector<4x128xf32> -> vector<38x128xf32>
    %73 = vector.extract_strided_slice %72 {offsets = [0, 0], sizes = [30, 128], strides = [1, 1]} : vector<38x128xf32> to vector<30x128xf32>
    %74 = vector.extract_strided_slice %72 {offsets = [1, 0], sizes = [30, 128], strides = [1, 1]} : vector<38x128xf32> to vector<30x128xf32>
    %75 = vector.extract_strided_slice %72 {offsets = [2, 0], sizes = [30, 128], strides = [1, 1]} : vector<38x128xf32> to vector<30x128xf32>
    %76 = vector.extract_strided_slice %72 {offsets = [3, 0], sizes = [30, 128], strides = [1, 1]} : vector<38x128xf32> to vector<30x128xf32>
    %77 = vector.extract_strided_slice %72 {offsets = [4, 0], sizes = [30, 128], strides = [1, 1]} : vector<38x128xf32> to vector<30x128xf32>
    %78 = vector.extract_strided_slice %72 {offsets = [5, 0], sizes = [30, 128], strides = [1, 1]} : vector<38x128xf32> to vector<30x128xf32>
    %79 = vector.extract_strided_slice %72 {offsets = [6, 0], sizes = [30, 128], strides = [1, 1]} : vector<38x128xf32> to vector<30x128xf32>
    %80 = vector.extract_strided_slice %72 {offsets = [7, 0], sizes = [30, 128], strides = [1, 1]} : vector<38x128xf32> to vector<30x128xf32>
    %81 = vector.extract_strided_slice %72 {offsets = [8, 0], sizes = [30, 128], strides = [1, 1]} : vector<38x128xf32> to vector<30x128xf32>
    %82 = tpu.concatenate %73, %74, %75, %76, %77, %78, %79, %80, %81 in 1 : vector<30x128xf32>, vector<30x128xf32>, vector<30x128xf32>, vector<30x128xf32>, vector<30x128xf32>, vector<30x128xf32>, vector<30x128xf32>, vector<30x128xf32>, vector<30x128xf32> -> vector<30x1152xf32>
    %83 = arith.truncf %82 : vector<30x1152xf32> to vector<30x1152xbf16>
    %c0_44 = arith.constant 0 : index
    %c0_45 = arith.constant 0 : index
    %84 = vector.load %arg5[%c0_44, %c0_45] : memref<1152x32xbf16, #tpu.memory_space<vmem>>, vector<1152x32xbf16>
    %cst_46 = arith.constant dense<0.000000e+00> : vector<30x32xf32>
    %85 = tpu.matmul %83, %84, %cst_46 {dimension_numbers = #tpu.dot_dimension_numbers<[1], [0], [0], [1], [0, 0, 1, 1], [], []>} : vector<30x1152xbf16>, vector<1152x32xbf16>, vector<30x32xf32> -> vector<30x32xf32>
    %c0_47 = arith.constant 0 : index
    %c0_48 = arith.constant 0 : index
    %86 = vector.load %arg6[%c0_47, %c0_48] : memref<1x32xf32, #tpu.memory_space<vmem>>, vector<1x32xf32>
    %87 = vector.broadcast %86 : vector<1x32xf32> to vector<30x32xf32>
    %88 = arith.addf %85, %87 : vector<30x32xf32>
    %cst_49 = arith.constant 0.000000e+00 : f32
    %89 = vector.broadcast %cst_49 : f32 to vector<30x32xf32>
    %90 = arith.maximumf %88, %89 : vector<30x32xf32>
    %91 = vector.extract_strided_slice %90 {offsets = [0, 0], sizes = [10, 32], strides = [1, 1]} : vector<30x32xf32> to vector<10x32xf32>
    %cst_50 = arith.constant dense<0xFF800000> : vector<32xf32>
    %92 = vector.multi_reduction <maximumf>, %91, %cst_50 [0] : vector<10x32xf32> to vector<32xf32>
    %93 = vector.shape_cast %92 : vector<32xf32> to vector<1x32xf32>
    %94 = vector.extract_strided_slice %90 {offsets = [10, 0], sizes = [10, 32], strides = [1, 1]} : vector<30x32xf32> to vector<10x32xf32>
    %cst_51 = arith.constant dense<0xFF800000> : vector<32xf32>
    %95 = vector.multi_reduction <maximumf>, %94, %cst_51 [0] : vector<10x32xf32> to vector<32xf32>
    %96 = vector.shape_cast %95 : vector<32xf32> to vector<1x32xf32>
    %97 = vector.extract_strided_slice %90 {offsets = [20, 0], sizes = [10, 32], strides = [1, 1]} : vector<30x32xf32> to vector<10x32xf32>
    %cst_52 = arith.constant dense<0xFF800000> : vector<32xf32>
    %98 = vector.multi_reduction <maximumf>, %97, %cst_52 [0] : vector<10x32xf32> to vector<32xf32>
    %99 = vector.shape_cast %98 : vector<32xf32> to vector<1x32xf32>
    %c0_53 = arith.constant 0 : index
    %c0_54 = arith.constant 0 : index
    %c0_55 = arith.constant 0 : index
    %100 = vector.load %arg2[%c0_53, %c0_54, %c0_55] : memref<1x1x8xf32, #tpu.memory_space<vmem>>, vector<1x1x8xf32>
    %101 = vector.shape_cast %100 : vector<1x1x8xf32> to vector<1x8xf32>
    %102 = arith.truncf %101 : vector<1x8xf32> to vector<1x8xbf16>
    %c0_56 = arith.constant 0 : index
    %c0_57 = arith.constant 0 : index
    %103 = vector.load %arg8[%c0_56, %c0_57] : memref<8x64xbf16, #tpu.memory_space<vmem>>, vector<8x64xbf16>
    %cst_58 = arith.constant dense<0.000000e+00> : vector<1x64xf32>
    %104 = tpu.matmul %102, %103, %cst_58 {dimension_numbers = #tpu.dot_dimension_numbers<[1], [0], [0], [1], [0, 0, 1, 1], [], []>} : vector<1x8xbf16>, vector<8x64xbf16>, vector<1x64xf32> -> vector<1x64xf32>
    %105 = arith.truncf %93 : vector<1x32xf32> to vector<1x32xbf16>
    %c0_59 = arith.constant 0 : index
    %c0_60 = arith.constant 0 : index
    %c0_61 = arith.constant 0 : index
    %106 = vector.load %arg7[%c0_59, %c0_60, %c0_61] : memref<3x32x64xbf16, #tpu.memory_space<vmem>>, vector<1x32x64xbf16>
    %107 = vector.shape_cast %106 : vector<1x32x64xbf16> to vector<32x64xbf16>
    %cst_62 = arith.constant dense<0.000000e+00> : vector<1x64xf32>
    %108 = tpu.matmul %105, %107, %cst_62 {dimension_numbers = #tpu.dot_dimension_numbers<[1], [0], [0], [1], [0, 0, 1, 1], [], []>} : vector<1x32xbf16>, vector<32x64xbf16>, vector<1x64xf32> -> vector<1x64xf32>
    %109 = arith.addf %104, %108 : vector<1x64xf32>
    %110 = arith.truncf %96 : vector<1x32xf32> to vector<1x32xbf16>
    %c1_63 = arith.constant 1 : index
    %c0_64 = arith.constant 0 : index
    %c0_65 = arith.constant 0 : index
    %111 = vector.load %arg7[%c1_63, %c0_64, %c0_65] : memref<3x32x64xbf16, #tpu.memory_space<vmem>>, vector<1x32x64xbf16>
    %112 = vector.shape_cast %111 : vector<1x32x64xbf16> to vector<32x64xbf16>
    %cst_66 = arith.constant dense<0.000000e+00> : vector<1x64xf32>
    %113 = tpu.matmul %110, %112, %cst_66 {dimension_numbers = #tpu.dot_dimension_numbers<[1], [0], [0], [1], [0, 0, 1, 1], [], []>} : vector<1x32xbf16>, vector<32x64xbf16>, vector<1x64xf32> -> vector<1x64xf32>
    %114 = arith.addf %109, %113 : vector<1x64xf32>
    %115 = arith.truncf %99 : vector<1x32xf32> to vector<1x32xbf16>
    %c2_67 = arith.constant 2 : index
    %c0_68 = arith.constant 0 : index
    %c0_69 = arith.constant 0 : index
    %116 = vector.load %arg7[%c2_67, %c0_68, %c0_69] : memref<3x32x64xbf16, #tpu.memory_space<vmem>>, vector<1x32x64xbf16>
    %117 = vector.shape_cast %116 : vector<1x32x64xbf16> to vector<32x64xbf16>
    %cst_70 = arith.constant dense<0.000000e+00> : vector<1x64xf32>
    %118 = tpu.matmul %115, %117, %cst_70 {dimension_numbers = #tpu.dot_dimension_numbers<[1], [0], [0], [1], [0, 0, 1, 1], [], []>} : vector<1x32xbf16>, vector<32x64xbf16>, vector<1x64xf32> -> vector<1x64xf32>
    %119 = arith.addf %114, %118 : vector<1x64xf32>
    %c0_71 = arith.constant 0 : index
    %c0_72 = arith.constant 0 : index
    %120 = vector.load %arg9[%c0_71, %c0_72] : memref<1x64xf32, #tpu.memory_space<vmem>>, vector<1x64xf32>
    %121 = arith.addf %119, %120 : vector<1x64xf32>
    %cst_73 = arith.constant 0.000000e+00 : f32
    %122 = vector.broadcast %cst_73 : f32 to vector<1x64xf32>
    %123 = arith.maximumf %121, %122 : vector<1x64xf32>
    %124 = arith.truncf %123 : vector<1x64xf32> to vector<1x64xbf16>
    %c0_74 = arith.constant 0 : index
    %c0_75 = arith.constant 0 : index
    %125 = vector.load %arg10[%c0_74, %c0_75] : memref<64x7xbf16, #tpu.memory_space<vmem>>, vector<64x7xbf16>
    %cst_76 = arith.constant dense<0.000000e+00> : vector<1x7xf32>
    %126 = tpu.matmul %124, %125, %cst_76 {dimension_numbers = #tpu.dot_dimension_numbers<[1], [0], [0], [1], [0, 0, 1, 1], [], []>} : vector<1x64xbf16>, vector<64x7xbf16>, vector<1x7xf32> -> vector<1x7xf32>
    %c0_77 = arith.constant 0 : index
    %c0_78 = arith.constant 0 : index
    %127 = vector.load %arg11[%c0_77, %c0_78] : memref<1x7xf32, #tpu.memory_space<vmem>>, vector<1x7xf32>
    %128 = arith.addf %126, %127 : vector<1x7xf32>
    %c0_79 = arith.constant 0 : index
    %c0_80 = arith.constant 0 : index
    %c0_81 = arith.constant 0 : index
    %129 = vector.load %arg12[%c0_79, %c0_80, %c0_81] : memref<1x1x7xf32, #tpu.memory_space<vmem>>, vector<1x1x7xf32>
    %130 = vector.shape_cast %129 : vector<1x1x7xf32> to vector<1x7xf32>
    %131 = vector.shape_cast %128 : vector<1x7xf32> to vector<1x1x7xf32>
    tpu.vector_store %arg12[%c0_79, %c0_80, %c0_81], %131 {strides = array<i32>} : memref<1x1x7xf32, #tpu.memory_space<vmem>>, vector<1x1x7xf32>,
    return
  }
  func.func @transform_0(%arg0: i32) -> (i32, i32, i32) {
    %c0_i32 = arith.constant 0 : i32
    %c0_i32_0 = arith.constant 0 : i32
    %c0_i32_1 = arith.constant 0 : i32
    return %arg0, %c0_i32, %c0_i32_0 : i32, i32, i32
  }
  func.func @transform_1(%arg0: i32) -> (i32, i32, i32) {
    %c0_i32 = arith.constant 0 : i32
    %c0_i32_0 = arith.constant 0 : i32
    %c0_i32_1 = arith.constant 0 : i32
    return %arg0, %c0_i32, %c0_i32_0 : i32, i32, i32
  }
  func.func @transform_2(%arg0: i32) -> (i32, i32) {
    %c0_i32 = arith.constant 0 : i32
    %c0_i32_0 = arith.constant 0 : i32
    %c0_i32_1 = arith.constant 0 : i32
    return %c0_i32, %c0_i32_0 : i32, i32
  }
  func.func @transform_3(%arg0: i32) -> (i32, i32) {
    %c0_i32 = arith.constant 0 : i32
    %c0_i32_0 = arith.constant 0 : i32
    %c0_i32_1 = arith.constant 0 : i32
    return %c0_i32, %c0_i32_0 : i32, i32
  }
  func.func @transform_4(%arg0: i32) -> (i32, i32) {
    %c0_i32 = arith.constant 0 : i32
    %c0_i32_0 = arith.constant 0 : i32
    %c0_i32_1 = arith.constant 0 : i32
    return %c0_i32, %c0_i32_0 : i32, i32
  }
  func.func @transform_5(%arg0: i32) -> (i32, i32) {
    %c0_i32 = arith.constant 0 : i32
    %c0_i32_0 = arith.constant 0 : i32
    %c0_i32_1 = arith.constant 0 : i32
    return %c0_i32, %c0_i32_0 : i32, i32
  }
  func.func @transform_6(%arg0: i32) -> (i32, i32, i32) {
    %c0_i32 = arith.constant 0 : i32
    %c0_i32_0 = arith.constant 0 : i32
    %c0_i32_1 = arith.constant 0 : i32
    %c0_i32_2 = arith.constant 0 : i32
    return %c0_i32, %c0_i32_0, %c0_i32_1 : i32, i32, i32
  }
  func.func @transform_7(%arg0: i32) -> (i32, i32) {
    %c0_i32 = arith.constant 0 : i32
    %c0_i32_0 = arith.constant 0 : i32
    %c0_i32_1 = arith.constant 0 : i32
    return %c0_i32, %c0_i32_0 : i32, i32
  }
  func.func @transform_8(%arg0: i32) -> (i32, i32) {
    %c0_i32 = arith.constant 0 : i32
    %c0_i32_0 = arith.constant 0 : i32
    %c0_i32_1 = arith.constant 0 : i32
    return %c0_i32, %c0_i32_0 : i32, i32
  }
  func.func @transform_9(%arg0: i32) -> (i32, i32) {
    %c0_i32 = arith.constant 0 : i32
    %c0_i32_0 = arith.constant 0 : i32
    %c0_i32_1 = arith.constant 0 : i32
    return %c0_i32, %c0_i32_0 : i32, i32
  }
  func.func @transform_10(%arg0: i32) -> (i32, i32) {
    %c0_i32 = arith.constant 0 : i32
    %c0_i32_0 = arith.constant 0 : i32
    %c0_i32_1 = arith.constant 0 : i32
    return %c0_i32, %c0_i32_0 : i32, i32
  }
  func.func @transform_11(%arg0: i32) -> (i32, i32, i32) {
    %c0_i32 = arith.constant 0 : i32
    %c0_i32_0 = arith.constant 0 : i32
    %c0_i32_1 = arith.constant 0 : i32
    return %arg0, %c0_i32, %c0_i32_0 : i32, i32, i32
  }
}

</mosaic_0001>

<bundles_post_ra>
// kernel: cnn1d_forward.1
= control target key start
LH: loop header
LB: loop body
LE: loop exit
PB: predicated region body
PF: predicated region fallthrough
CT: control target
= control target key end

     0   :  { %s4701_s0 = inlined_call_operand.vmem [shape: bf16[2,904,24], index: 0, kind: input, shape index: {}]   ;;  %s4702_s1 = inlined_call_operand.vmem [shape: f32[2,1,8], index: 1, kind: input, shape index: {}]   ;;  %s4703_s2 = inlined_call_operand.vmem [shape: bf16[24,128], index: 2, kind: input, shape index: {}]   ;;  %s4704_s3 = inlined_call_operand.vmem [shape: f32[1,128], index: 3, kind: input, shape index: {}]   ;;  %s4705_s4 = inlined_call_operand.vmem [shape: bf16[1152,32], index: 4, kind: input, shape index: {}]   ;;  %s4706_s5 = inlined_call_operand.vmem [shape: f32[1,32], index: 5, kind: input, shape index: {}]   ;;  %s4707_s6 = inlined_call_operand.vmem [shape: bf16[3,32,64], index: 6, kind: input, shape index: {}]   ;;  %s4708_s7 = inlined_call_operand.vmem [shape: bf16[8,64], index: 7, kind: input, shape index: {}]   ;;  %s4709_s8 = inlined_call_operand.vmem [shape: f32[1,64], index: 8, kind: input, shape index: {}]   ;;  %s4710_s9 = inlined_call_operand.vmem [shape: bf16[64,7], index: 9, kind: input, shape index: {}]   ;;  %s4711_s10 = inlined_call_operand.vmem [shape: f32[1,7], index: 10, kind: input, shape index: {}]   ;;  %s4712_s11 = inlined_call_operand.hbm [shape: f32[2,1,7], index: 11, kind: output, shape index: {}]  }
   0x1   :  { %4713 = sst [smem:[#allocation6_spill]] %s4701_s0 }
   0x2   :  { %4714 = sst [smem:[#allocation7_spill]] %s4702_s1 }
   0x3   :  { %16 = vsyncpa [#allocation4], 0 }
   0x4   :  { %18 = vsyncpa [#allocation4 + $0x1], 0  ;;  %s3996_s17 = smov 0   ;;  %s3998_s18 = smov 0  }
   0x5   :  { %s4000_s19 = smov 0   ;;  %s4002_s20 = smov 0  }
   0x6 LB: > { %s4017_s21 = sadd.s32 4294967295, %s3932_s20   ;;  %s3040_s22 = sadd.s32 4294967294, %s3932_s20   ;;  %s3932_s20 = sphi %s4002_s20, %s4724_s20   ;;  %s3928_s19 = sphi %s4000_s19, %s4723_s19   ;;  %s3924_s18 = sphi %s3998_s18, %s4722_s18   ;;  %s3920_s17 = sphi %s3996_s17, %s4721_s17  }
   0x7   : > { %s4021_s23 = sadd.s32 1, %s3932_s20   ;;  %s272_s24 = sadd.s32 1, %s3928_s19 }
   0x8   : > { %s269_s25 = ssub.s32 %s3932_s20, %s4021_s23  ;;  %p282_p0 = scmp.ne.s32.totalorder %s3928_s19, %s3924_s18 }
   0x9   : > { %p270_p1 = scmp.eq.s32.totalorder %s269_s25, 0  ;;  %p283_p2 = scmp.eq.s32.totalorder %s4017_s21, 1 }
   0xa   : > { %p288_p3 = scmp.ne.s32.totalorder %s3924_s18, %s3920_s17  ;;  %p289_p4 = scmp.eq.s32.totalorder %s3040_s22, 1 }
   0xb   : > { %s4032_s26 = scalar_select %p270_p1, %s3928_s19, %s272_s24  }
   0xc   : > { %p4034_p5 = por %p283_p2, %p282_p0  ;;  %p4038_p6 = por %p289_p4, %p288_p3 }
   0xd   : > { %p3043_p7 = scmp.ge.s32.totalorder %s3932_s20, 1  ;;  %p348_p8 = scmp.lt.s32.totalorder %s3932_s20, 3 }
   0xf   : > { %p349_p9 = pnand %p3043_p7, %p348_p8 }
  0x10   : > { %p390_p10 = scmp.lt.s32.totalorder (!%p349_p9), %s4017_s21, 1  ;;  %s4717_s0 = sld [smem:[#allocation6_spill]] (!%p349_p9) }
  0x11   : > { %352 = sbr.rel (%p349_p9) target bundleno = 1084 (0x43c), region = 64  ;;  %s4720_s1 = sld [smem:[#allocation7_spill]] (!%p349_p9) }
  0x12   : > { %s3890_s29 = scalar_lea.hbm (!%p349_p9), %s4712_s11, 2 }
  0x16   : > { %v514_v0 = vld [vmem:[%s4703_s2 + $0x8] sm:$0xf]  ;;  %vm983_vm0 = vcmask 1043456   ;;  %s4049_s12 = scalar_select %p390_p10, %s4017_s21, 1  ;;  %v3736_v4 = vld [vmem:[%s4703_s2] sm:$0xff]  ;;  %vm811_vm1 = vcmask 195584  }
  0x17   : > { %v807_v1 = vunpack.c.l.b16 %v514_v0  ;;  %v4128_v37 = vld [vmem:[%s4704_s3] ss:$0 sm:$0xff]  ;;  %v3934_v48 = vmov 0.0   ;;  %vm4431_vm2 = vmneg %vm983_vm0  ;;  %vm3935_vm3 = vmmov 1   ;;  %vm1882_vm5 = vcmask 1046528  }
  0x18   : > { %s3825_s13 = smul.u32 452, %s4049_s12  ;;  %vm3619_vm4 = vmpackc.low %vm3935_vm3, %vm4431_vm2  ;;  %vm1894_vm6 = vcmask 1045504   ;;  %vm1961_vm7 = vcmask 1040384   ;;  %vm1907_vm8 = vcmask 1044480   ;;  %vm1934_vm9 = vcmask 1042432   ;;  %s397_s30 = scalar_lea.vmem %s4720_s1, %s4049_s12 }
  0x19   : > { %v809_v2 = vpack.c.b16 %v807_v1, %v807_v1  ;;  %vm1879_vm10 = vcmask 1041408   ;;  %vm2817_vm12 = vcmask 64512   ;;  %vm2748_vm13 = vcmask 261120  }
  0x1a   : > { %s4059_s24 = scalar_lea.vmem %s4717_s0, %s3825_s13  ;;  %vm3622_vm11 = vmpackc.low %vm1879_vm10, %vm3935_vm3  ;;  %vm2750_vm14 = vcmask 254976   ;;  %vm2759_vm15 = vcmask 261122   ;;  %vm2772_vm2 = vcmask 259072   ;;  %vm2944_vm3 = vcmask 523264  }
  0x1b   : > { %v985_v3 = vsel %vm983_vm0, %v809_v2, 0  ;;  %v3680_v5 = vld [vmem:[%s4059_s24] sm:$0xff]  ;;  %v3701_v6 = vld [vmem:[%s4059_s24 + $0xa8] sm:$0xff]  ;;  %v3723_v7 = vld [vmem:[%s4059_s24 + $0x158] sm:$0xff] }
  0x1c   : > { %993 = vmatpush.bf16.msra.mxu0 %v985_v3  ;;  %3819 = vmatpush.bf16.msra.mxu1 %v985_v3  ;;  %v3713_v8 = vld [vmem:[%s4059_s24 + $0x108] sm:$0xff]  ;;  %v3702_v10 = vld [vmem:[%s4059_s24 + $0xb0] sm:$0xff]  ;;  %v3724_v11 = vld [vmem:[%s4059_s24 + $0x160] sm:$0xff] }
  0x1d   : > { %3821 = vmatpush.bf16.msra.mxu3 %v985_v3  ;;  %3820 = vmatpush.bf16.msra.mxu2 %v985_v3  ;;  %v3681_v9 = vld [vmem:[%s4059_s24 + $0x8] sm:$0xff]  ;;  %v3714_v12 = vld [vmem:[%s4059_s24 + $0x110] sm:$0xff]  ;;  %v3703_v14 = vld [vmem:[%s4059_s24 + $0xb8] sm:$0xff] }
  0x1e   : > { %v3682_v13 = vld [vmem:[%s4059_s24 + $0x10] sm:$0xff]  ;;  %v3725_v15 = vld [vmem:[%s4059_s24 + $0x168] sm:$0xff]  ;;  %v3715_v16 = vld [vmem:[%s4059_s24 + $0x118] sm:$0xff] }
  0x1f   : > { %v3683_v17 = vld [vmem:[%s4059_s24 + $0x18] sm:$0xff]  ;;  %v3704_v18 = vld [vmem:[%s4059_s24 + $0xc0] sm:$0xff]  ;;  %v3726_v19 = vld [vmem:[%s4059_s24 + $0x170] sm:$0xff] }
  0x20   : > { %994 = vmatpush.bf16.msra.mxu0 %v3736_v4  ;;  %3822 = vmatpush.bf16.msra.mxu1 %v3736_v4  ;;  %v3716_v20 = vld [vmem:[%s4059_s24 + $0x120] sm:$0xff]  ;;  %v3705_v22 = vld [vmem:[%s4059_s24 + $0xc8] sm:$0xff]  ;;  %v3727_v23 = vld [vmem:[%s4059_s24 + $0x178] sm:$0xff] }
  0x21   : > { %3824 = vmatpush.bf16.msra.mxu3 %v3736_v4  ;;  %3823 = vmatpush.bf16.msra.mxu2 %v3736_v4  ;;  %v3684_v21 = vld [vmem:[%s4059_s24 + $0x20] sm:$0xff]  ;;  %v3717_v24 = vld [vmem:[%s4059_s24 + $0x128] sm:$0xff]  ;;  %v3706_v26 = vld [vmem:[%s4059_s24 + $0xd0] sm:$0xff] }
  0x22   : > { %v3685_v25 = vld [vmem:[%s4059_s24 + $0x28] sm:$0xff]  ;;  %v3728_v27 = vld [vmem:[%s4059_s24 + $0x180] sm:$0xff]  ;;  %v3718_v28 = vld [vmem:[%s4059_s24 + $0x130] sm:$0xff] }
  0x23   : > { %3273 = vmatmul.msk.bf16.vlgmr.msra.gmra.mxu0 %vm811_vm1, %v3680_v5  ;;  %3294 = vmatmul.msk.bf16.vlgmr.msra.gmra.mxu1 %vm811_vm1, %v3701_v6  ;;  %v3686_v29 = vld [vmem:[%s4059_s24 + $0x30] sm:$0xff]  ;;  %v3707_v30 = vld [vmem:[%s4059_s24 + $0xd8] sm:$0xff]  ;;  %v3729_v31 = vld [vmem:[%s4059_s24 + $0x188] sm:$0xff] }
  0x24   : > { %3316 = vmatmul.msk.bf16.vlgmr.msra.gmra.mxu3 %vm811_vm1, %v3723_v7  ;;  %3306 = vmatmul.msk.bf16.vlgmr.msra.gmra.mxu2 %vm811_vm1, %v3713_v8  ;;  %v3719_v32 = vld [vmem:[%s4059_s24 + $0x138] sm:$0xff]  ;;  %v3708_v34 = vld [vmem:[%s4059_s24 + $0xe0] sm:$0xff]  ;;  %v3730_v35 = vld [vmem:[%s4059_s24 + $0x190] sm:$0xff] }
  0x25   : > { %v3687_v33 = vld [vmem:[%s4059_s24 + $0x38] sm:$0xff]  ;;  %v3720_v36 = vld [vmem:[%s4059_s24 + $0x140] sm:$0xff]  ;;  %v3709_v39 = vld [vmem:[%s4059_s24 + $0xe8] sm:$0xff] }
  0x26   : > { %v3688_v38 = vld [vmem:[%s4059_s24 + $0x40] sm:$0xff]  ;;  %v3731_v42 = vld [vmem:[%s4059_s24 + $0x198] sm:$0xff]  ;;  %v3721_v43 = vld [vmem:[%s4059_s24 + $0x148] sm:$0xff] }
  0x27   : > { %v3689_v62 = vld [vmem:[%s4059_s24 + $0x48] sm:$0xff]  ;;  %v3710_v63 = vld [vmem:[%s4059_s24 + $0xf0] sm:$0xff]  ;;  %v3732_v4 = vld [vmem:[%s4059_s24 + $0x1a0] sm:$0xff] }
  0x28   : > { %v3722_v6 = vld [vmem:[%s4059_s24 + $0x150] sm:$0xff] }
  0x33   : > { %3274 = vmatmul.msk.bf16.gmra.mxu0 %vm811_vm1, %v3681_v9  ;;  %3295 = vmatmul.msk.bf16.gmra.mxu1 %vm811_vm1, %v3702_v10 }
  0x34   : > { %3317 = vmatmul.msk.bf16.gmra.mxu3 %vm811_vm1, %v3724_v11  ;;  %3307 = vmatmul.msk.bf16.gmra.mxu2 %vm811_vm1, %v3714_v12 }
  0x43   : > { %3275 = vmatmul.msk.bf16.gmra.mxu0 %vm811_vm1, %v3682_v13  ;;  %3296 = vmatmul.msk.bf16.gmra.mxu1 %vm811_vm1, %v3703_v14 }
  0x44   : > { %3318 = vmatmul.msk.bf16.gmra.mxu3 %vm811_vm1, %v3725_v15  ;;  %3308 = vmatmul.msk.bf16.gmra.mxu2 %vm811_vm1, %v3715_v16 }
  0x53   : > { %3276 = vmatmul.msk.bf16.gmra.mxu0 %vm811_vm1, %v3683_v17  ;;  %3297 = vmatmul.msk.bf16.gmra.mxu1 %vm811_vm1, %v3704_v18 }
  0x54   : > { %3319 = vmatmul.msk.bf16.gmra.mxu3 %vm811_vm1, %v3726_v19  ;;  %3309 = vmatmul.msk.bf16.gmra.mxu2 %vm811_vm1, %v3716_v20 }
  0x63   : > { %3277 = vmatmul.msk.bf16.gmra.mxu0 %vm811_vm1, %v3684_v21  ;;  %3298 = vmatmul.msk.bf16.gmra.mxu1 %vm811_vm1, %v3705_v22 }
  0x64   : > { %3320 = vmatmul.msk.bf16.gmra.mxu3 %vm811_vm1, %v3727_v23  ;;  %3310 = vmatmul.msk.bf16.gmra.mxu2 %vm811_vm1, %v3717_v24 }
  0x73   : > { %3278 = vmatmul.msk.bf16.gmra.mxu0 %vm811_vm1, %v3685_v25  ;;  %3299 = vmatmul.msk.bf16.gmra.mxu1 %vm811_vm1, %v3706_v26  ;;  %v3690_v26 = vld [vmem:[%s4059_s24 + $0x50] sm:$0xff] }
  0x74   : > { %3321 = vmatmul.msk.bf16.gmra.mxu3 %vm811_vm1, %v3728_v27  ;;  %3311 = vmatmul.msk.bf16.gmra.mxu2 %vm811_vm1, %v3718_v28  ;;  %v3711_v27 = vld [vmem:[%s4059_s24 + $0xf8] sm:$0xff] }
  0x83   : > { %3279 = vmatmul.msk.bf16.gmra.mxu0 %vm811_vm1, %v3686_v29  ;;  %3300 = vmatmul.msk.bf16.gmra.mxu1 %vm811_vm1, %v3707_v30 }
  0x84   : > { %3322 = vmatmul.msk.bf16.gmra.mxu3 %vm811_vm1, %v3729_v31  ;;  %3312 = vmatmul.msk.bf16.gmra.mxu2 %vm811_vm1, %v3719_v32  ;;  %v3733_v32 = vld [vmem:[%s4059_s24 + $0x1a8] sm:$0xff] }
  0x93   : > { %3280 = vmatmul.msk.bf16.gmra.mxu0 %vm811_vm1, %v3687_v33  ;;  %3301 = vmatmul.msk.bf16.gmra.mxu1 %vm811_vm1, %v3708_v34 }
  0x94   : > { %3323 = vmatmul.msk.bf16.gmra.mxu3 %vm811_vm1, %v3730_v35  ;;  %3313 = vmatmul.msk.bf16.gmra.mxu2 %vm811_vm1, %v3720_v36 }
  0xa0   : > { %v996_v40 = vpop.f32.mrf.mxu0  ;;  %v1101_v41 = vpop.f32.mrf.mxu1 }
  0xa1   : > { %v997_v44 = vadd.f32 %v4128_v37, %v996_v40  ;;  %v1102_v45 = vadd.f32 %v4128_v37, %v1101_v41 }
  0xa3   : > { %v1280_v46 = vmax.f32 %v997_v44, 0.0  ;;  %v1322_v47 = vmax.f32 %v1102_v45, 0.0  ;;  %3281 = vmatmul.msk.bf16.gmra.mxu0 %vm811_vm1, %v3688_v38  ;;  %3302 = vmatmul.msk.bf16.gmra.mxu1 %vm811_vm1, %v3709_v39 }
  0xa4   : > { %3324 = vmatmul.msk.bf16.gmra.mxu3 %vm811_vm1, %v3731_v42  ;;  %3314 = vmatmul.msk.bf16.gmra.mxu2 %vm811_vm1, %v3721_v43 }
  0xa5   : > { %1393 = vst [vmem:[#allocation2] sm:$0xff] %v1280_v46 }
  0xa6   : > { %1506 = vst [vmem:[#allocation2] sm:$0x1] %v3934_v48 }
  0xa7   : > { %1435 = vst [vmem:[#allocation2 + $0x150] sm:$0xff] %v1322_v47  ;;  %v1211_v49 = vpop.f32.mrf.mxu3  ;;  %v1161_v50 = vpop.f32.mrf.mxu2 }
  0xa8   : > { %v1212_v51 = vadd.f32 %v4128_v37, %v1211_v49  ;;  %v998_v52 = vpop.f32.mrf.mxu0  ;;  %v1103_v53 = vpop.f32.mrf.mxu1  ;;  %v1162_v54 = vadd.f32 %v4128_v37, %v1161_v50 }
  0xa9   : > { %v999_v55 = vadd.f32 %v4128_v37, %v998_v52  ;;  %v1104_v56 = vadd.f32 %v4128_v37, %v1103_v53 }
  0xaa   : > { %v1366_v57 = vmax.f32 %v1212_v51, 0.0  ;;  %v1346_v60 = vmax.f32 %v1162_v54, 0.0  ;;  %v3691_v54 = vld [vmem:[%s4059_s24 + $0x58] sm:$0xff] }
  0xab   : > { %v1281_v58 = vmax.f32 %v999_v55, 0.0  ;;  %v1323_v59 = vmax.f32 %v1104_v56, 0.0  ;;  %v3712_v55 = vld [vmem:[%s4059_s24 + $0x100] sm:$0xff] }
  0xac   : > { %1479 = vst [vmem:[#allocation2 + $0x2b0] sm:$0xff] %v1366_v57 }
  0xad   : > { %1394 = vst [vmem:[#allocation2 + $0x8] sm:$0xff] %v1281_v58 }
  0xae   : > { %1436 = vst [vmem:[#allocation2 + $0x158] sm:$0xff] %v1323_v59 }
  0xaf   : > { %v1213_v61 = vpop.f32.mrf.mxu3  ;;  %1459 = vst [vmem:[#allocation2 + $0x210] sm:$0xff] %v1346_v60  ;;  %v1163_v0 = vpop.f32.mrf.mxu2  ;;  %v3734_v60 = vld [vmem:[%s4059_s24 + $0x1b0] sm:$0xff] }
  0xb0   : > { %v1214_v1 = vadd.f32 %v4128_v37, %v1213_v61  ;;  %v1001_v2 = vpop.f32.mrf.mxu0  ;;  %v1106_v3 = vpop.f32.mrf.mxu1  ;;  %v1164_v5 = vadd.f32 %v4128_v37, %v1163_v0 }
  0xb1   : > { %v1002_v7 = vadd.f32 %v4128_v37, %v1001_v2  ;;  %v1107_v8 = vadd.f32 %v4128_v37, %v1106_v3 }
  0xb2   : > { %v1367_v9 = vmax.f32 %v1214_v1, 0.0  ;;  %v1347_v12 = vmax.f32 %v1164_v5, 0.0 }
  0xb3   : > { %v1282_v10 = vmax.f32 %v1002_v7, 0.0  ;;  %v1324_v11 = vmax.f32 %v1107_v8, 0.0  ;;  %3282 = vmatmul.msk.bf16.gmra.mxu0 %vm811_vm1, %v3689_v62  ;;  %3303 = vmatmul.msk.bf16.gmra.mxu1 %vm811_vm1, %v3710_v63 }
  0xb4   : > { %1480 = vst [vmem:[#allocation2 + $0x2b8] sm:$0xff] %v1367_v9  ;;  %3325 = vmatmul.msk.bf16.gmra.mxu3 %vm811_vm1, %v3732_v4  ;;  %3315 = vmatmul.msk.bf16.gmra.mxu2 %vm811_vm1, %v3722_v6 }
  0xb5   : > { %1395 = vst [vmem:[#allocation2 + $0x10] sm:$0xff] %v1282_v10 }
  0xb6   : > { %1437 = vst [vmem:[#allocation2 + $0x160] sm:$0xff] %v1324_v11 }
  0xb7   : > { %v1216_v13 = vpop.f32.mrf.mxu3  ;;  %1460 = vst [vmem:[#allocation2 + $0x218] sm:$0xff] %v1347_v12  ;;  %v1166_v14 = vpop.f32.mrf.mxu2 }
  0xb8   : > { %v1217_v15 = vadd.f32 %v4128_v37, %v1216_v13  ;;  %v1003_v16 = vpop.f32.mrf.mxu0  ;;  %v1108_v17 = vpop.f32.mrf.mxu1  ;;  %v1167_v18 = vadd.f32 %v4128_v37, %v1166_v14 }
  0xb9   : > { %v1004_v19 = vadd.f32 %v4128_v37, %v1003_v16  ;;  %v1109_v20 = vadd.f32 %v4128_v37, %v1108_v17  ;;  %v3692_v17 = vld [vmem:[%s4059_s24 + $0x60] sm:$0xff] }
  0xba   : > { %v1368_v21 = vmax.f32 %v1217_v15, 0.0  ;;  %v1348_v24 = vmax.f32 %v1167_v18, 0.0 }
  0xbb   : > { %v1283_v22 = vmax.f32 %v1004_v19, 0.0  ;;  %v1325_v23 = vmax.f32 %v1109_v20, 0.0 }
  0xbc   : > { %1481 = vst [vmem:[#allocation2 + $0x2c0] sm:$0xff] %v1368_v21 }
  0xbd   : > { %1396 = vst [vmem:[#allocation2 + $0x18] sm:$0xff] %v1283_v22  ;;  %v3735_v22 = vld [vmem:[%s4059_s24 + $0x1b8] sm:$0xff] }
  0xbe   : > { %1438 = vst [vmem:[#allocation2 + $0x168] sm:$0xff] %v1325_v23 }
  0xbf   : > { %v1218_v25 = vpop.f32.mrf.mxu3  ;;  %1461 = vst [vmem:[#allocation2 + $0x220] sm:$0xff] %v1348_v24  ;;  %v1168_v28 = vpop.f32.mrf.mxu2 }
  0xc0   : > { %v1219_v29 = vadd.f32 %v4128_v37, %v1218_v25  ;;  %v1006_v30 = vpop.f32.mrf.mxu0  ;;  %v1111_v31 = vpop.f32.mrf.mxu1  ;;  %v1169_v33 = vadd.f32 %v4128_v37, %v1168_v28 }
  0xc1   : > { %v1007_v34 = vadd.f32 %v4128_v37, %v1006_v30  ;;  %v1112_v35 = vadd.f32 %v4128_v37, %v1111_v31 }
  0xc2   : > { %v1369_v36 = vmax.f32 %v1219_v29, 0.0  ;;  %v1349_v40 = vmax.f32 %v1169_v33, 0.0 }
  0xc3   : > { %v1284_v38 = vmax.f32 %v1007_v34, 0.0  ;;  %v1326_v39 = vmax.f32 %v1112_v35, 0.0  ;;  %3283 = vmatmul.msk.bf16.gmra.mxu0 %vm811_vm1, %v3690_v26  ;;  %3304 = vmatmul.msk.bf16.gmra.mxu1 %vm811_vm1, %v3711_v27 }
  0xc4   : > { %1482 = vst [vmem:[#allocation2 + $0x2c8] sm:$0xff] %v1369_v36  ;;  %3326 = vmatmul.msk.bf16.gmra.mxu3 %vm811_vm1, %v3733_v32 }
  0xc5   : > { %1397 = vst [vmem:[#allocation2 + $0x20] sm:$0xff] %v1284_v38 }
  0xc6   : > { %1439 = vst [vmem:[#allocation2 + $0x170] sm:$0xff] %v1326_v39  ;;  %v511_v39 = vld [vmem:[%s4059_s24 + $0x1c0] sm:$0x3] }
  0xc7   : > { %v1221_v41 = vpop.f32.mrf.mxu3  ;;  %1462 = vst [vmem:[#allocation2 + $0x228] sm:$0xff] %v1349_v40  ;;  %v1171_v42 = vpop.f32.mrf.mxu2 }
  0xc8   : > { %v1222_v43 = vadd.f32 %v4128_v37, %v1221_v41  ;;  %v1008_v44 = vpop.f32.mrf.mxu0  ;;  %v1113_v45 = vpop.f32.mrf.mxu1  ;;  %v1172_v46 = vadd.f32 %v4128_v37, %v1171_v42 }
  0xc9   : > { %v1009_v47 = vadd.f32 %v4128_v37, %v1008_v44  ;;  %v1114_v48 = vadd.f32 %v4128_v37, %v1113_v45  ;;  %v744_v44 = vunpack.c.l.b16 %v511_v39 }
  0xca   : > { %v1370_v49 = vmax.f32 %v1222_v43, 0.0  ;;  %v1350_v52 = vmax.f32 %v1172_v46, 0.0  ;;  %v3693_v46 = vld [vmem:[%s4059_s24 + $0x68] sm:$0xff] }
  0xcb   : > { %v1285_v50 = vmax.f32 %v1009_v47, 0.0  ;;  %v1327_v51 = vmax.f32 %v1114_v48, 0.0 }
  0xcc   : > { %1483 = vst [vmem:[#allocation2 + $0x2d0] sm:$0xff] %v1370_v49 }
  0xcd   : > { %1398 = vst [vmem:[#allocation2 + $0x28] sm:$0xff] %v1285_v50 }
  0xce   : > { %1440 = vst [vmem:[#allocation2 + $0x178] sm:$0xff] %v1327_v51  ;;  %v801_v51 = vpack.c.b16 %v744_v44, %v744_v44 }
  0xcf   : > { %v1223_v53 = vpop.f32.mrf.mxu3  ;;  %1463 = vst [vmem:[#allocation2 + $0x230] sm:$0xff] %v1350_v52  ;;  %v1173_v56 = vpop.f32.mrf.mxu2 }
  0xd0   : > { %v1224_v57 = vadd.f32 %v4128_v37, %v1223_v53  ;;  %v1011_v58 = vpop.f32.mrf.mxu0  ;;  %v1116_v59 = vpop.f32.mrf.mxu1  ;;  %v1174_v61 = vadd.f32 %v4128_v37, %v1173_v56 }
  0xd1   : > { %v1012_v62 = vadd.f32 %v4128_v37, %v1011_v58  ;;  %v1117_v63 = vadd.f32 %v4128_v37, %v1116_v59 }
  0xd2   : > { %v1371_v0 = vmax.f32 %v1224_v57, 0.0  ;;  %v1351_v3 = vmax.f32 %v1174_v61, 0.0 }
  0xd3   : > { %v1286_v1 = vmax.f32 %v1012_v62, 0.0  ;;  %v1328_v2 = vmax.f32 %v1117_v63, 0.0  ;;  %3284 = vmatmul.msk.bf16.gmra.mxu0 %vm811_vm1, %v3691_v54  ;;  %3305 = vmatmul.msk.bf16.gmra.mxu1 %vm811_vm1, %v3712_v55 }
  0xd4   : > { %1484 = vst [vmem:[#allocation2 + $0x2d8] sm:$0xff] %v1371_v0  ;;  %3327 = vmatmul.msk.bf16.gmra.mxu3 %vm811_vm1, %v3734_v60 }
  0xd5   : > { %1399 = vst [vmem:[#allocation2 + $0x30] sm:$0xff] %v1286_v1 }
  0xd6   : > { %1441 = vst [vmem:[#allocation2 + $0x180] sm:$0xff] %v1328_v2 }
  0xd7   : > { %v1226_v4 = vpop.f32.mrf.mxu3  ;;  %1464 = vst [vmem:[#allocation2 + $0x238] sm:$0xff] %v1351_v3  ;;  %v1176_v5 = vpop.f32.mrf.mxu2 }
  0xd8   : > { %v1227_v6 = vadd.f32 %v4128_v37, %v1226_v4  ;;  %v1013_v7 = vpop.f32.mrf.mxu0  ;;  %v1118_v8 = vpop.f32.mrf.mxu1  ;;  %v1177_v9 = vadd.f32 %v4128_v37, %v1176_v5 }
  0xd9   : > { %v1014_v10 = vadd.f32 %v4128_v37, %v1013_v7  ;;  %v1119_v11 = vadd.f32 %v4128_v37, %v1118_v8  ;;  %v3694_v8 = vld [vmem:[%s4059_s24 + $0x70] sm:$0xff] }
  0xda   : > { %v1372_v12 = vmax.f32 %v1227_v6, 0.0  ;;  %v1352_v15 = vmax.f32 %v1177_v9, 0.0 }
  0xdb   : > { %v1287_v13 = vmax.f32 %v1014_v10, 0.0  ;;  %v1329_v14 = vmax.f32 %v1119_v11, 0.0 }
  0xdc   : > { %1485 = vst [vmem:[#allocation2 + $0x2e0] sm:$0xff] %v1372_v12 }
  0xdd   : > { %1400 = vst [vmem:[#allocation2 + $0x38] sm:$0xff] %v1287_v13 }
  0xde   : > { %1442 = vst [vmem:[#allocation2 + $0x188] sm:$0xff] %v1329_v14 }
  0xdf   : > { %v1228_v16 = vpop.f32.mrf.mxu3  ;;  %1465 = vst [vmem:[#allocation2 + $0x240] sm:$0xff] %v1352_v15  ;;  %v1178_v18 = vpop.f32.mrf.mxu2 }
  0xe0   : > { %v1229_v19 = vadd.f32 %v4128_v37, %v1228_v16  ;;  %v1016_v20 = vpop.f32.mrf.mxu0  ;;  %v1121_v21 = vpop.f32.mrf.mxu1  ;;  %v1179_v23 = vadd.f32 %v4128_v37, %v1178_v18 }
  0xe1   : > { %v1017_v24 = vadd.f32 %v4128_v37, %v1016_v20  ;;  %v1122_v25 = vadd.f32 %v4128_v37, %v1121_v21 }
  0xe2   : > { %v1373_v26 = vmax.f32 %v1229_v19, 0.0  ;;  %v1353_v29 = vmax.f32 %v1179_v23, 0.0 }
  0xe3   : > { %v1288_v27 = vmax.f32 %v1017_v24, 0.0  ;;  %v1330_v28 = vmax.f32 %v1122_v25, 0.0  ;;  %3285 = vmatmul.msk.bf16.gmra.mxu0 %vm811_vm1, %v3692_v17 }
  0xe4   : > { %1486 = vst [vmem:[#allocation2 + $0x2e8] sm:$0xff] %v1373_v26  ;;  %3328 = vmatmul.msk.bf16.gmra.mxu3 %vm811_vm1, %v3735_v22 }
  0xe5   : > { %1401 = vst [vmem:[#allocation2 + $0x40] sm:$0xff] %v1288_v27 }
  0xe6   : > { %1443 = vst [vmem:[#allocation2 + $0x190] sm:$0xff] %v1330_v28 }
  0xe7   : > { %v1231_v30 = vpop.f32.mrf.mxu3  ;;  %1466 = vst [vmem:[#allocation2 + $0x248] sm:$0xff] %v1353_v29  ;;  %v1181_v31 = vpop.f32.mrf.mxu2 }
  0xe8   : > { %v1232_v32 = vadd.f32 %v4128_v37, %v1231_v30  ;;  %v1018_v33 = vpop.f32.mrf.mxu0  ;;  %v1123_v34 = vpop.f32.mrf.mxu1  ;;  %v1182_v35 = vadd.f32 %v4128_v37, %v1181_v31 }
  0xe9   : > { %v1019_v36 = vadd.f32 %v4128_v37, %v1018_v33  ;;  %v1124_v38 = vadd.f32 %v4128_v37, %v1123_v34  ;;  %v3695_v33 = vld [vmem:[%s4059_s24 + $0x78] sm:$0xff] }
  0xea   : > { %v1374_v40 = vmax.f32 %v1232_v32, 0.0  ;;  %v1354_v43 = vmax.f32 %v1182_v35, 0.0 }
  0xeb   : > { %v1289_v41 = vmax.f32 %v1019_v36, 0.0  ;;  %v1331_v42 = vmax.f32 %v1124_v38, 0.0 }
  0xec   : > { %1487 = vst [vmem:[#allocation2 + $0x2f0] sm:$0xff] %v1374_v40 }
  0xed   : > { %1402 = vst [vmem:[#allocation2 + $0x48] sm:$0xff] %v1289_v41 }
  0xee   : > { %1444 = vst [vmem:[#allocation2 + $0x198] sm:$0xff] %v1331_v42 }
  0xef   : > { %v1233_v45 = vpop.f32.mrf.mxu3  ;;  %1467 = vst [vmem:[#allocation2 + $0x250] sm:$0xff] %v1354_v43  ;;  %v1183_v47 = vpop.f32.mrf.mxu2 }
  0xf0   : > { %v1234_v48 = vadd.f32 %v4128_v37, %v1233_v45  ;;  %v1021_v49 = vpop.f32.mrf.mxu0  ;;  %v1126_v50 = vpop.f32.mrf.mxu1  ;;  %v1184_v52 = vadd.f32 %v4128_v37, %v1183_v47 }
  0xf1   : > { %v1022_v53 = vadd.f32 %v4128_v37, %v1021_v49  ;;  %v1127_v54 = vadd.f32 %v4128_v37, %v1126_v50 }
  0xf2   : > { %v1375_v55 = vmax.f32 %v1234_v48, 0.0  ;;  %v1355_v58 = vmax.f32 %v1184_v52, 0.0 }
  0xf3   : > { %v1290_v56 = vmax.f32 %v1022_v53, 0.0  ;;  %v1332_v57 = vmax.f32 %v1127_v54, 0.0  ;;  %3286 = vmatmul.msk.bf16.gmra.mxu0 %vm811_vm1, %v3693_v46 }
  0xf4   : > { %1488 = vst [vmem:[#allocation2 + $0x2f8] sm:$0xff] %v1375_v55  ;;  %3329 = vmatmul.msk.bf16.gmra.mxu3 %vm811_vm1, %v801_v51 }
  0xf5   : > { %1403 = vst [vmem:[#allocation2 + $0x50] sm:$0xff] %v1290_v56 }
  0xf6   : > { %1445 = vst [vmem:[#allocation2 + $0x1a0] sm:$0xff] %v1332_v57 }
  0xf7   : > { %v1236_v59 = vpop.f32.mrf.mxu3  ;;  %1468 = vst [vmem:[#allocation2 + $0x258] sm:$0xff] %v1355_v58  ;;  %v1186_v60 = vpop.f32.mrf.mxu2 }
  0xf8   : > { %v1237_v61 = vadd.f32 %v4128_v37, %v1236_v59  ;;  %v1023_v62 = vpop.f32.mrf.mxu0  ;;  %v1128_v63 = vpop.f32.mrf.mxu1  ;;  %v1187_v0 = vadd.f32 %v4128_v37, %v1186_v60  ;;  %v3696_v59 = vld [vmem:[%s4059_s24 + $0x80] sm:$0xff] }
  0xf9   : > { %v1024_v1 = vadd.f32 %v4128_v37, %v1023_v62  ;;  %v1129_v2 = vadd.f32 %v4128_v37, %v1128_v63 }
  0xfa   : > { %v1376_v3 = vmax.f32 %v1237_v61, 0.0  ;;  %v1356_v6 = vmax.f32 %v1187_v0, 0.0 }
  0xfb   : > { %v1291_v4 = vmax.f32 %v1024_v1, 0.0  ;;  %v1333_v5 = vmax.f32 %v1129_v2, 0.0 }
  0xfc   : > { %1489 = vst [vmem:[#allocation2 + $0x300] sm:$0xff] %v1376_v3 }
  0xfd   : > { %1404 = vst [vmem:[#allocation2 + $0x58] sm:$0xff] %v1291_v4 }
  0xfe   : > { %1446 = vst [vmem:[#allocation2 + $0x1a8] sm:$0xff] %v1333_v5 }
  0xff   : > { %v1238_v7 = vpop.f32.mrf.mxu3  ;;  %1469 = vst [vmem:[#allocation2 + $0x260] sm:$0xff] %v1356_v6  ;;  %v1188_v9 = vpop.f32.mrf.mxu2 }
 0x100   : > { %v1239_v10 = vadd.f32 %v4128_v37, %v1238_v7  ;;  %v1026_v11 = vpop.f32.mrf.mxu0  ;;  %v1131_v12 = vpop.f32.mrf.mxu1  ;;  %v1189_v13 = vadd.f32 %v4128_v37, %v1188_v9 }
 0x101   : > { %v1027_v14 = vadd.f32 %v4128_v37, %v1026_v11  ;;  %v1132_v15 = vadd.f32 %v4128_v37, %v1131_v12 }
 0x102   : > { %v1377_v16 = vmax.f32 %v1239_v10, 0.0  ;;  %v1357_v19 = vmax.f32 %v1189_v13, 0.0 }
 0x103   : > { %v1292_v17 = vmax.f32 %v1027_v14, 0.0  ;;  %v1334_v18 = vmax.f32 %v1132_v15, 0.0  ;;  %3287 = vmatmul.msk.bf16.gmra.mxu0 %vm811_vm1, %v3694_v8 }
 0x104   : > { %1490 = vst [vmem:[#allocation2 + $0x308] sm:$0xff] %v1377_v16 }
 0x105   : > { %1405 = vst [vmem:[#allocation2 + $0x60] sm:$0xff] %v1292_v17 }
 0x106   : > { %1447 = vst [vmem:[#allocation2 + $0x1b0] sm:$0xff] %v1334_v18 }
 0x107   : > { %v1241_v20 = vpop.f32.mrf.mxu3  ;;  %1470 = vst [vmem:[#allocation2 + $0x268] sm:$0xff] %v1357_v19  ;;  %v1191_v21 = vpop.f32.mrf.mxu2 }
 0x108   : > { %v1242_v22 = vadd.f32 %v4128_v37, %v1241_v20  ;;  %v1028_v23 = vpop.f32.mrf.mxu0  ;;  %v1133_v24 = vpop.f32.mrf.mxu1  ;;  %v1192_v25 = vadd.f32 %v4128_v37, %v1191_v21  ;;  %v3697_v20 = vld [vmem:[%s4059_s24 + $0x88] sm:$0xff] }
 0x109   : > { %v1029_v26 = vadd.f32 %v4128_v37, %v1028_v23  ;;  %v1134_v27 = vadd.f32 %v4128_v37, %v1133_v24 }
 0x10a   : > { %v1378_v28 = vmax.f32 %v1242_v22, 0.0  ;;  %v1358_v31 = vmax.f32 %v1192_v25, 0.0 }
 0x10b   : > { %v1293_v29 = vmax.f32 %v1029_v26, 0.0  ;;  %v1335_v30 = vmax.f32 %v1134_v27, 0.0 }
 0x10c   : > { %1491 = vst [vmem:[#allocation2 + $0x310] sm:$0xff] %v1378_v28 }
 0x10d   : > { %1406 = vst [vmem:[#allocation2 + $0x68] sm:$0xff] %v1293_v29 }
 0x10e   : > { %1448 = vst [vmem:[#allocation2 + $0x1b8] sm:$0xff] %v1335_v30 }
 0x10f   : > { %v1243_v32 = vpop.f32.mrf.mxu3  ;;  %1471 = vst [vmem:[#allocation2 + $0x270] sm:$0xff] %v1358_v31  ;;  %v1193_v34 = vpop.f32.mrf.mxu2 }
 0x110   : > { %v1244_v35 = vadd.f32 %v4128_v37, %v1243_v32  ;;  %v1031_v36 = vpop.f32.mrf.mxu0  ;;  %v1136_v38 = vpop.f32.mrf.mxu1  ;;  %v1194_v39 = vadd.f32 %v4128_v37, %v1193_v34 }
 0x111   : > { %v1032_v40 = vadd.f32 %v4128_v37, %v1031_v36  ;;  %v1137_v41 = vadd.f32 %v4128_v37, %v1136_v38 }
 0x112   : > { %v1379_v42 = vmax.f32 %v1244_v35, 0.0  ;;  %v1359_v45 = vmax.f32 %v1194_v39, 0.0 }
 0x113   : > { %v1294_v43 = vmax.f32 %v1032_v40, 0.0  ;;  %v1336_v44 = vmax.f32 %v1137_v41, 0.0  ;;  %3288 = vmatmul.msk.bf16.gmra.mxu0 %vm811_vm1, %v3695_v33 }
 0x114   : > { %1492 = vst [vmem:[#allocation2 + $0x318] sm:$0xff] %v1379_v42 }
 0x115   : > { %1407 = vst [vmem:[#allocation2 + $0x70] sm:$0xff] %v1294_v43 }
 0x116   : > { %1449 = vst [vmem:[#allocation2 + $0x1c0] sm:$0xff] %v1336_v44 }
 0x117   : > { %v1246_v46 = vpop.f32.mrf.mxu3  ;;  %1472 = vst [vmem:[#allocation2 + $0x278] sm:$0xff] %v1359_v45  ;;  %v1196_v47 = vpop.f32.mrf.mxu2 }
 0x118   : > { %v1247_v48 = vadd.f32 %v4128_v37, %v1246_v46  ;;  %v1033_v49 = vpop.f32.mrf.mxu0  ;;  %v1138_v50 = vpop.f32.mrf.mxu1  ;;  %v1197_v51 = vadd.f32 %v4128_v37, %v1196_v47  ;;  %v3698_v46 = vld [vmem:[%s4059_s24 + $0x90] sm:$0xff] }
 0x119   : > { %v1034_v52 = vadd.f32 %v4128_v37, %v1033_v49  ;;  %v1139_v53 = vadd.f32 %v4128_v37, %v1138_v50 }
 0x11a   : > { %v1380_v54 = vmax.f32 %v1247_v48, 0.0  ;;  %v1360_v57 = vmax.f32 %v1197_v51, 0.0 }
 0x11b   : > { %v1295_v55 = vmax.f32 %v1034_v52, 0.0  ;;  %v1337_v56 = vmax.f32 %v1139_v53, 0.0 }
 0x11c   : > { %1493 = vst [vmem:[#allocation2 + $0x320] sm:$0xff] %v1380_v54 }
 0x11d   : > { %1408 = vst [vmem:[#allocation2 + $0x78] sm:$0xff] %v1295_v55 }
 0x11e   : > { %1450 = vst [vmem:[#allocation2 + $0x1c8] sm:$0xff] %v1337_v56 }
 0x11f   : > { %v1248_v58 = vpop.f32.mrf.mxu3  ;;  %1473 = vst [vmem:[#allocation2 + $0x280] sm:$0xff] %v1360_v57  ;;  %v1198_v60 = vpop.f32.mrf.mxu2 }
 0x120   : > { %v1249_v61 = vadd.f32 %v4128_v37, %v1248_v58  ;;  %v1036_v62 = vpop.f32.mrf.mxu0  ;;  %v1141_v63 = vpop.f32.mrf.mxu1  ;;  %v1199_v0 = vadd.f32 %v4128_v37, %v1198_v60 }
 0x121   : > { %v1037_v1 = vadd.f32 %v4128_v37, %v1036_v62  ;;  %v1142_v2 = vadd.f32 %v4128_v37, %v1141_v63 }
 0x122   : > { %v1381_v3 = vmax.f32 %v1249_v61, 0.0  ;;  %v1361_v6 = vmax.f32 %v1199_v0, 0.0 }
 0x123   : > { %v1296_v4 = vmax.f32 %v1037_v1, 0.0  ;;  %v1338_v5 = vmax.f32 %v1142_v2, 0.0  ;;  %3289 = vmatmul.msk.bf16.gmra.mxu0 %vm811_vm1, %v3696_v59 }
 0x124   : > { %1494 = vst [vmem:[#allocation2 + $0x328] sm:$0xff] %v1381_v3 }
 0x125   : > { %1409 = vst [vmem:[#allocation2 + $0x80] sm:$0xff] %v1296_v4  ;;  %v3699_v4 = vld [vmem:[%s4059_s24 + $0x98] sm:$0xff] }
 0x126   : > { %1451 = vst [vmem:[#allocation2 + $0x1d0] sm:$0xff] %v1338_v5 }
 0x127   : > { %v1251_v7 = vpop.f32.mrf.mxu3  ;;  %1474 = vst [vmem:[#allocation2 + $0x288] sm:$0xff] %v1361_v6  ;;  %v1201_v8 = vpop.f32.mrf.mxu2 }
 0x128   : > { %v1252_v9 = vadd.f32 %v4128_v37, %v1251_v7  ;;  %v1038_v10 = vpop.f32.mrf.mxu0  ;;  %v1143_v11 = vpop.f32.mrf.mxu1  ;;  %v1202_v12 = vadd.f32 %v4128_v37, %v1201_v8 }
 0x129   : > { %v1039_v13 = vadd.f32 %v4128_v37, %v1038_v10  ;;  %v1144_v14 = vadd.f32 %v4128_v37, %v1143_v11 }
 0x12a   : > { %v1382_v15 = vmax.f32 %v1252_v9, 0.0  ;;  %v1362_v18 = vmax.f32 %v1202_v12, 0.0 }
 0x12b   : > { %v1297_v16 = vmax.f32 %v1039_v13, 0.0  ;;  %v1339_v17 = vmax.f32 %v1144_v14, 0.0 }
 0x12c   : > { %1495 = vst [vmem:[#allocation2 + $0x330] sm:$0xff] %v1382_v15 }
 0x12d   : > { %1410 = vst [vmem:[#allocation2 + $0x88] sm:$0xff] %v1297_v16 }
 0x12e   : > { %1452 = vst [vmem:[#allocation2 + $0x1d8] sm:$0xff] %v1339_v17 }
 0x12f   : > { %v1253_v19 = vpop.f32.mrf.mxu3  ;;  %1475 = vst [vmem:[#allocation2 + $0x290] sm:$0xff] %v1362_v18  ;;  %v1203_v21 = vpop.f32.mrf.mxu2 }
 0x130   : > { %v1254_v22 = vadd.f32 %v4128_v37, %v1253_v19  ;;  %v1041_v23 = vpop.f32.mrf.mxu0  ;;  %v1146_v24 = vpop.f32.mrf.mxu1  ;;  %v1204_v25 = vadd.f32 %v4128_v37, %v1203_v21 }
 0x131   : > { %v1042_v26 = vadd.f32 %v4128_v37, %v1041_v23  ;;  %v1147_v27 = vadd.f32 %v4128_v37, %v1146_v24  ;;  %v3700_v23 = vld [vmem:[%s4059_s24 + $0xa0] sm:$0xff]  ;;  %s388_s24 = sand.u32 1, %s3924_s18  }
 0x132   : > { %v1383_v28 = vmax.f32 %v1254_v22, 0.0  ;;  %v1363_v31 = vmax.f32 %v1204_v25, 0.0  ;;  %s389_s12 = scalar_lea.vmem [#allocation3], %s388_s24  ;;  %s2964_s16 = scalar_lea.sflag [#allocation4], %s388_s24 }
 0x133   : > { %v1298_v29 = vmax.f32 %v1042_v26, 0.0  ;;  %v1340_v30 = vmax.f32 %v1147_v27, 0.0  ;;  %3290 = vmatmul.msk.bf16.gmra.mxu0 %vm811_vm1, %v3697_v20  ;;  %s2974_s14 = sshll.u32 %s389_s12, 4  ;;  %s2975_s14 = int_to_ptr.vmem [resolvable:$true] %s2974_s14 }
 0x134   : > { %1496 = vst [vmem:[#allocation2 + $0x338] sm:$0xff] %v1383_v28 }
 0x135   : > { %1411 = vst [vmem:[#allocation2 + $0x90] sm:$0xff] %v1298_v29 }
 0x136   : > { %1453 = vst [vmem:[#allocation2 + $0x1e0] sm:$0xff] %v1340_v30 }
 0x137   : > { %v1256_v32 = vpop.f32.mrf.mxu3  ;;  %1476 = vst [vmem:[#allocation2 + $0x298] sm:$0xff] %v1363_v31  ;;  %v1206_v33 = vpop.f32.mrf.mxu2 }
 0x138   : > { %v1257_v34 = vadd.f32 %v4128_v37, %v1256_v32  ;;  %v1043_v35 = vpop.f32.mrf.mxu0  ;;  %v1148_v36 = vpop.f32.mrf.mxu1  ;;  %v1207_v38 = vadd.f32 %v4128_v37, %v1206_v33  ;;  %v3760_v32 = vld [vmem:[%s4705_s4 + $0xb8] sm:$0xff] }
 0x139   : > { %v1044_v39 = vadd.f32 %v4128_v37, %v1043_v35  ;;  %v1149_v40 = vadd.f32 %v4128_v37, %v1148_v36  ;;  %2611 = vmatpush.bf16.msrb.mxu3 %v3760_v32  ;;  %v3749_v32 = vld [vmem:[%s4705_s4 + $0x60] sm:$0xff] }
 0x13a   : > { %v1384_v41 = vmax.f32 %v1257_v34, 0.0  ;;  %v1364_v44 = vmax.f32 %v1207_v38, 0.0 }
 0x13b   : > { %v1299_v42 = vmax.f32 %v1044_v39, 0.0  ;;  %v1341_v43 = vmax.f32 %v1149_v40, 0.0 }
 0x13c   : > { %1497 = vst [vmem:[#allocation2 + $0x340] sm:$0xff] %v1384_v41 }
 0x13d   : > { %1412 = vst [vmem:[#allocation2 + $0x98] sm:$0xff] %v1299_v42 }
 0x13e   : > { %1454 = vst [vmem:[#allocation2 + $0x1e8] sm:$0xff] %v1341_v43 }
 0x13f   : > { %v1258_v45 = vpop.f32.mrf.mxu3  ;;  %1477 = vst [vmem:[#allocation2 + $0x2a0] sm:$0xff] %v1364_v44  ;;  %v1208_v47 = vpop.f32.mrf.mxu2 }
 0x140   : > { %v1259_v48 = vadd.f32 %v4128_v37, %v1258_v45  ;;  %v1046_v49 = vpop.f32.mrf.mxu0  ;;  %v1151_v50 = vpop.f32.mrf.mxu1  ;;  %v1209_v51 = vadd.f32 %v4128_v37, %v1208_v47 }
 0x141   : > { %v1047_v52 = vadd.f32 %v4128_v37, %v1046_v49  ;;  %v1152_v53 = vadd.f32 %v4128_v37, %v1151_v50 }
 0x142   : > { %v1385_v54 = vmax.f32 %v1259_v48, 0.0  ;;  %v1365_v57 = vmax.f32 %v1209_v51, 0.0 }
 0x143   : > { %v1300_v55 = vmax.f32 %v1047_v52, 0.0  ;;  %v1342_v56 = vmax.f32 %v1152_v53, 0.0  ;;  %3291 = vmatmul.msk.bf16.gmra.mxu0 %vm811_vm1, %v3698_v46  ;;  %v3759_v46 = vld [vmem:[%s4705_s4 + $0xb0] sm:$0xff]  ;;  %v3744_v52 = vld [vmem:[%s4705_s4 + $0x38] sm:$0xff] }
 0x144   : > { %1498 = vst [vmem:[#allocation2 + $0x348] sm:$0xff] %v1385_v54  ;;  %2612 = vmatpush.bf16.msrb.mxu3 %v3759_v46  ;;  %2573 = vmatpush.bf16.msrb.mxu1 %v3744_v52 }
 0x145   : > { %1413 = vst [vmem:[#allocation2 + $0xa0] sm:$0xff] %v1300_v55  ;;  %v3758_v55 = vld [vmem:[%s4705_s4 + $0xa8] sm:$0xff] }
 0x146   : > { %1455 = vst [vmem:[#allocation2 + $0x1f0] sm:$0xff] %v1342_v56  ;;  %v3743_v56 = vld [vmem:[%s4705_s4 + $0x30] sm:$0xff] }
 0x147   : > { %v1261_v58 = vpop.f32.mrf.mxu3  ;;  %1478 = vst [vmem:[#allocation2 + $0x2a8] sm:$0xff] %v1365_v57  ;;  %v3752_v57 = vld [vmem:[%s4705_s4 + $0x78] sm:$0xff] }
 0x148   : > { %v1262_v59 = vadd.f32 %v4128_v37, %v1261_v58  ;;  %v1048_v60 = vpop.f32.mrf.mxu0  ;;  %v1153_v61 = vpop.f32.mrf.mxu1  ;;  %2613 = vmatpush.bf16.msrb.mxu3 %v3758_v55  ;;  %2574 = vmatpush.bf16.msrb.mxu1 %v3743_v56 }
 0x149   : > { %v1049_v62 = vadd.f32 %v4128_v37, %v1048_v60  ;;  %v1154_v63 = vadd.f32 %v4128_v37, %v1153_v61  ;;  %2592 = vmatpush.bf16.msrb.mxu2 %v3752_v57  ;;  %v3742_v61 = vld [vmem:[%s4705_s4 + $0x28] sm:$0xff] }
 0x14a   : > { %v1386_v0 = vmax.f32 %v1262_v59, 0.0 }
 0x14b   : > { %v1301_v1 = vmax.f32 %v1049_v62, 0.0  ;;  %v1343_v2 = vmax.f32 %v1154_v63, 0.0  ;;  %v3751_v62 = vld [vmem:[%s4705_s4 + $0x70] sm:$0xff] }
 0x14c   : > { %1499 = vst [vmem:[#allocation2 + $0x350] sm:$0xff] %v1386_v0  ;;  %v3757_v0 = vld [vmem:[%s4705_s4 + $0xa0] sm:$0xff]  ;;  %2575 = vmatpush.bf16.msrb.mxu1 %v3742_v61 }
 0x14d   : > { %1414 = vst [vmem:[#allocation2 + $0xa8] sm:$0xff] %v1301_v1  ;;  %2593 = vmatpush.bf16.msrb.mxu2 %v3751_v62  ;;  %2614 = vmatpush.bf16.msrb.mxu3 %v3757_v0 }
 0x14e   : > { %1456 = vst [vmem:[#allocation2 + $0x1f8] sm:$0xff] %v1343_v2 }
 0x14f   : > { %v1263_v3 = vpop.f32.mrf.mxu3 }
 0x150   : > { %v1264_v5 = vadd.f32 %v4128_v37, %v1263_v3  ;;  %v1051_v6 = vpop.f32.mrf.mxu0  ;;  %v1156_v7 = vpop.f32.mrf.mxu1 }
 0x151   : > { %v1052_v8 = vadd.f32 %v4128_v37, %v1051_v6  ;;  %v1157_v9 = vadd.f32 %v4128_v37, %v1156_v7  ;;  %v3750_v6 = vld [vmem:[%s4705_s4 + $0x68] sm:$0xff] }
 0x152   : > { %v1387_v10 = vmax.f32 %v1264_v5, 0.0  ;;  %2594 = vmatpush.bf16.msrb.mxu2 %v3750_v6 }
 0x153   : > { %v1302_v11 = vmax.f32 %v1052_v8, 0.0  ;;  %v1344_v12 = vmax.f32 %v1157_v9, 0.0  ;;  %3292 = vmatmul.msk.bf16.gmra.mxu0 %vm811_vm1, %v3699_v4 }
 0x154   : > { %1500 = vst [vmem:[#allocation2 + $0x358] sm:$0xff] %v1387_v10  ;;  %v3741_v10 = vld [vmem:[%s4705_s4 + $0x20] sm:$0xff] }
 0x155   : > { %1415 = vst [vmem:[#allocation2 + $0xb0] sm:$0xff] %v1302_v11  ;;  %2576 = vmatpush.bf16.msrb.mxu1 %v3741_v10 }
 0x156   : > { %1457 = vst [vmem:[#allocation2 + $0x200] sm:$0xff] %v1344_v12  ;;  %2595 = vmatpush.bf16.msrb.mxu2 %v3749_v32 }
 0x157   : > { %v1266_v13 = vpop.f32.mrf.mxu3 }
 0x158   : > { %v1267_v14 = vadd.f32 %v4128_v37, %v1266_v13  ;;  %v1053_v15 = vpop.f32.mrf.mxu0  ;;  %v1158_v16 = vpop.f32.mrf.mxu1 }
 0x159   : > { %v1054_v17 = vadd.f32 %v4128_v37, %v1053_v15  ;;  %v1159_v18 = vadd.f32 %v4128_v37, %v1158_v16 }
 0x15a   : > { %v1388_v19 = vmax.f32 %v1267_v14, 0.0  ;;  %v3756_v14 = vld [vmem:[%s4705_s4 + $0x98] sm:$0xff] }
 0x15b   : > { %v1303_v20 = vmax.f32 %v1054_v17, 0.0  ;;  %v1345_v21 = vmax.f32 %v1159_v18, 0.0  ;;  %2615 = vmatpush.bf16.msrb.mxu3 %v3756_v14 }
 0x15c   : > { %1501 = vst [vmem:[#allocation2 + $0x360] sm:$0xff] %v1388_v19 }
 0x15d   : > { %1416 = vst [vmem:[#allocation2 + $0xb8] sm:$0xff] %v1303_v20  ;;  %v1567_v57 = vld [vmem:[#allocation2 + $0x1e5] ss:$30 sm:$0xff]  ;;  %v1579_v0 = vld [vmem:[#allocation2 + $0x1e6] ss:$30 sm:$0xff] }
 0x15e   : > { %1458 = vst [vmem:[#allocation2 + $0x208] sm:$0xff] %v1345_v21 }
 0x15f   : > { %v1268_v22 = vpop.f32.mrf.mxu3 }
 0x160   : > { %v1269_v24 = vadd.f32 %v4128_v37, %v1268_v22  ;;  %v1056_v25 = vpop.f32.mrf.mxu0 }
 0x161   : > { %v1057_v26 = vadd.f32 %v4128_v37, %v1056_v25  ;;  %v1511_v25 = vld [vmem:[#allocation2 + $0x1e0] ss:$30 sm:$0xff] }
 0x162   : > { %v1389_v27 = vmax.f32 %v1269_v24, 0.0 }
 0x163   : > { %3293 = vmatmul.msk.bf16.gmra.mxu0 %vm811_vm1, %v3700_v23  ;;  %v1304_v28 = vmax.f32 %v1057_v26, 0.0  ;;  %v1519_v26 = vld [vmem:[#allocation2 + $0x1e1] ss:$30 sm:$0xff]  ;;  %vm2770_vm1 = vcmask 261124  }
 0x164   : > { %1502 = vst [vmem:[#allocation2 + $0x368] sm:$0xff] %v1389_v27 }
 0x165   : > { %1417 = vst [vmem:[#allocation2 + $0xc0] sm:$0xff] %v1304_v28  ;;  %v1531_v28 = vld [vmem:[#allocation2 + $0x1e2] ss:$30 sm:$0xff] }
 0x167   : > { %v1271_v29 = vpop.f32.mrf.mxu3 }
 0x168   : > { %v1272_v30 = vadd.f32 %v4128_v37, %v1271_v29  ;;  %v1058_v31 = vpop.f32.mrf.mxu0 }
 0x169   : > { %v1059_v34 = vadd.f32 %v4128_v37, %v1058_v31 }
 0x16a   : > { %v1390_v33 = vmax.f32 %v1272_v30, 0.0  ;;  %v1524_v30 = vmax.f32 %v1511_v25, %v1519_v26 }
 0x16b   : > { %v1305_v35 = vmax.f32 %v1059_v34, 0.0  ;;  %v1533_v46 = vld [vmem:[#allocation2 + $0x2d2] ss:$30 sm:$0x3f] }
 0x16c   : > { %1503 = vst [vmem:[#allocation2 + $0x370] sm:$0xff] %v1390_v33  ;;  %v1536_v33 = vmax.f32 %v1524_v30, %v1531_v28  ;;  %v1557_v62 = vld [vmem:[#allocation2 + $0x2d4] ss:$30 sm:$0x3f] }
 0x16d   : > { %1418 = vst [vmem:[#allocation2 + $0xc8] sm:$0xff] %v1305_v35  ;;  %v1593_v26 = vld [vmem:[#allocation2 + $0x2d7] ss:$30 sm:$0x3f] }
 0x16f   : > { %v1273_v36 = vpop.f32.mrf.mxu3 }
 0x170   : > { %v1274_v38 = vadd.f32 %v4128_v37, %v1273_v36  ;;  %v1061_v39 = vpop.f32.mrf.mxu0  ;;  %v1513_v36 = vld [vmem:[#allocation2 + $0x2d0] ss:$30 sm:$0x3f] }
 0x171   : > { %v1062_v40 = vadd.f32 %v4128_v37, %v1061_v39 }
 0x172   : > { %v1391_v41 = vmax.f32 %v1274_v38, 0.0  ;;  %v1521_v38 = vld [vmem:[#allocation2 + $0x2d1] ss:$30 sm:$0x3f] }
 0x173   : > { %v1306_v42 = vmax.f32 %v1062_v40, 0.0 }
 0x174   : > { %1504 = vst [vmem:[#allocation2 + $0x378] sm:$0xff] %v1391_v41  ;;  %v1543_v41 = vld [vmem:[#allocation2 + $0x1e3] ss:$30 sm:$0xff] }
 0x175   : > { %1419 = vst [vmem:[#allocation2 + $0xd0] sm:$0xff] %v1306_v42  ;;  %v1548_v42 = vmax.f32 %v1536_v33, %v1543_v41  ;;  %v1605_v33 = vld [vmem:[#allocation2 + $0x2d8] ss:$30 sm:$0x3f] }
 0x177   : > { %v1276_v43 = vpop.f32.mrf.mxu3 }
 0x178   : > { %v1063_v44 = vpop.f32.mrf.mxu0  ;;  %v1277_v45 = vadd.f32 %v4128_v37, %v1276_v43 }
 0x179   : > { %v1064_v48 = vadd.f32 %v4128_v37, %v1063_v44  ;;  %v1525_v44 = vmax.f32 %v1513_v36, %v1521_v38 }
 0x17a   : > { %v1392_v47 = vmax.f32 %v1277_v45, 0.0 }
 0x17b   : > { %v1307_v51 = vmax.f32 %v1064_v48, 0.0  ;;  %v1555_v48 = vld [vmem:[#allocation2 + $0x1e4] ss:$30 sm:$0xff] }
 0x17c   : > { %1505 = vst [vmem:[#allocation2 + $0x380] sm:$0xf] %v1392_v47  ;;  %v1507_v17 = vld [vmem:[#allocation2] ss:$30 sm:$0xff]  ;;  %v1515_v18 = vld [vmem:[#allocation2 + $0x1] ss:$30 sm:$0xff] }
 0x17d   : > { %1420 = vst [vmem:[#allocation2 + $0xd8] sm:$0xff] %v1307_v51  ;;  %v1522_v20 = vmax.f32 %v1507_v17, %v1515_v18  ;;  %v1527_v21 = vld [vmem:[#allocation2 + $0x2] ss:$30 sm:$0xff]  ;;  %v1539_v29 = vld [vmem:[#allocation2 + $0x3] ss:$30 sm:$0xff]  ;;  %v1537_v51 = vmax.f32 %v1525_v44, %v1533_v46 }
 0x17e   : > { %v1551_v34 = vld [vmem:[#allocation2 + $0x4] ss:$30 sm:$0xff]  ;;  %v1563_v45 = vld [vmem:[#allocation2 + $0x5] ss:$30 sm:$0xff] }
 0x17f   : > { %v1278_v49 = vpop.f32.mrf.mxu3  ;;  %v1534_v23 = vmax.f32 %v1522_v20, %v1527_v21  ;;  %v1581_v18 = vld [vmem:[#allocation2 + $0x2d6] ss:$30 sm:$0x3f] }
 0x180   : > { %v1066_v50 = vpop.f32.mrf.mxu0  ;;  %v1560_v49 = vmax.f32 %v1548_v42, %v1555_v48  ;;  %v1617_v42 = vld [vmem:[#allocation2 + $0x2d9] ss:$30 sm:$0x3f] }
 0x181   : > { %v1067_v53 = vadd.f32 %v4128_v37, %v1066_v50  ;;  %v1546_v31 = vmax.f32 %v1534_v23, %v1539_v29  ;;  %v3740_v50 = vld [vmem:[%s4705_s4 + $0x18] sm:$0xff] }
 0x182   : > { %2577 = vmatpush.bf16.msrb.mxu1 %v3740_v50 }
 0x183   : > { %v1308_v54 = vmax.f32 %v1067_v53, 0.0  ;;  %v1558_v39 = vmax.f32 %v1546_v31, %v1551_v34  ;;  %v1627_v31 = vld [vmem:[#allocation2 + $0x1ea] ss:$30 sm:$0xff] }
 0x184   : > { %v1575_v52 = vld [vmem:[#allocation2 + $0x6] ss:$30 sm:$0xff]  ;;  %v1587_v61 = vld [vmem:[#allocation2 + $0x7] ss:$30 sm:$0xff] }
 0x185   : > { %1421 = vst [vmem:[#allocation2 + $0xe0] sm:$0xff] %v1308_v54  ;;  %v1570_v47 = vmax.f32 %v1558_v39, %v1563_v45  ;;  %v1545_v54 = vld [vmem:[#allocation2 + $0x2d3] ss:$30 sm:$0x3f]  ;;  %v1623_v20 = vld [vmem:[#allocation2 + $0xa] ss:$30 sm:$0xff] }
 0x186   : > { %v1611_v14 = vld [vmem:[#allocation2 + $0x9] ss:$30 sm:$0xff] }
 0x187   : > { %v1582_v55 = vmax.f32 %v1570_v47, %v1575_v52  ;;  %v1635_v29 = vld [vmem:[#allocation2 + $0xb] ss:$30 sm:$0xff]  ;;  %v1651_v47 = vld [vmem:[#allocation2 + $0x1ec] ss:$30 sm:$0xff] }
 0x188   : > { %v1068_v58 = vpop.f32.mrf.mxu0  ;;  %v1659_v45 = vld [vmem:[#allocation2 + $0xd] ss:$30 sm:$0xff] }
 0x189   : > { %v1069_v59 = vadd.f32 %v4128_v37, %v1068_v58  ;;  %v1572_v58 = vmax.f32 %v1560_v49, %v1567_v57  ;;  %v1629_v49 = vld [vmem:[#allocation2 + $0x2da] ss:$30 sm:$0x3f]  ;;  %v1641_v57 = vld [vmem:[#allocation2 + $0x2db] ss:$30 sm:$0x3f] }
 0x18b   : > { %v1309_v60 = vmax.f32 %v1069_v59, 0.0 }
 0x18d   : > { %1422 = vst [vmem:[#allocation2 + $0xe8] sm:$0xff] %v1309_v60  ;;  %v1549_v60 = vmax.f32 %v1537_v51, %v1545_v54  ;;  %v1671_v51 = vld [vmem:[#allocation2 + $0xe] ss:$30 sm:$0xff] }
 0x190   : > { %v1071_v63 = vpop.f32.mrf.mxu0 }
 0x191   : > { %v1072_v1 = vadd.f32 %v4128_v37, %v1071_v63  ;;  %v1594_v63 = vmax.f32 %v1582_v55, %v1587_v61  ;;  %v1663_v55 = vld [vmem:[#allocation2 + $0x1ed] ss:$30 sm:$0xff] }
 0x193   : > { %v1310_v2 = vmax.f32 %v1072_v1, 0.0  ;;  %v1584_v1 = vmax.f32 %v1572_v58, %v1579_v0  ;;  %v1653_v0 = vld [vmem:[#allocation2 + $0x2dc] ss:$30 sm:$0x3f] }
 0x195   : > { %1423 = vst [vmem:[#allocation2 + $0xf0] sm:$0xff] %v1310_v2  ;;  %v3755_v2 = vld [vmem:[%s4705_s4 + $0x90] sm:$0xff] }
 0x196   : > { %2616 = vmatpush.bf16.msrb.mxu3 %v3755_v2 }
 0x198   : > { %v1073_v3 = vpop.f32.mrf.mxu0 }
 0x199   : > { %v1074_v4 = vadd.f32 %v4128_v37, %v1073_v3  ;;  %v3748_v3 = vld [vmem:[%s4705_s4 + $0x58] sm:$0xff] }
 0x19a   : > { %2596 = vmatpush.bf16.msrb.mxu2 %v3748_v3  ;;  %v3739_v3 = vld [vmem:[%s4705_s4 + $0x10] sm:$0xff] }
 0x19b   : > { %v1311_v5 = vmax.f32 %v1074_v4, 0.0  ;;  %v1561_v4 = vmax.f32 %v1549_v60, %v1557_v62  ;;  %v1683_v60 = vld [vmem:[#allocation2 + $0xf] ss:$30 sm:$0xff]  ;;  %v1675_v62 = vld [vmem:[#allocation2 + $0x1ee] ss:$30 sm:$0xff]  ;;  %2578 = vmatpush.bf16.msrb.mxu1 %v3739_v3 }
 0x19d   : > { %1424 = vst [vmem:[#allocation2 + $0xf8] sm:$0xff] %v1311_v5  ;;  %v1599_v5 = vld [vmem:[#allocation2 + $0x8] ss:$30 sm:$0xff] }
 0x1a0   : > { %v1076_v7 = vpop.f32.mrf.mxu0 }
 0x1a1   : > { %v1077_v8 = vadd.f32 %v4128_v37, %v1076_v7  ;;  %v1606_v7 = vmax.f32 %v1594_v63, %v1599_v5 }
 0x1a3   : > { %v1312_v9 = vmax.f32 %v1077_v8, 0.0 }
 0x1a5   : > { %1425 = vst [vmem:[#allocation2 + $0x100] sm:$0xff] %v1312_v9  ;;  %v1591_v9 = vld [vmem:[#allocation2 + $0x1e7] ss:$30 sm:$0xff] }
 0x1a6   : > { %v1596_v10 = vmax.f32 %v1584_v1, %v1591_v9  ;;  %v1695_v1 = vld [vmem:[#allocation2 + $0x10] ss:$30 sm:$0xff] }
 0x1a8   : > { %v1078_v11 = vpop.f32.mrf.mxu0 }
 0x1a9   : > { %v1079_v12 = vadd.f32 %v4128_v37, %v1078_v11  ;;  %v1569_v11 = vld [vmem:[#allocation2 + $0x2d5] ss:$30 sm:$0x3f] }
 0x1ab   : > { %v1313_v13 = vmax.f32 %v1079_v12, 0.0 }
 0x1ad   : > { %1426 = vst [vmem:[#allocation2 + $0x108] sm:$0xff] %v1313_v13  ;;  %v1573_v13 = vmax.f32 %v1561_v4, %v1569_v11  ;;  %v3754_v4 = vld [vmem:[%s4705_s4 + $0x88] sm:$0xff]  ;;  %v3753_v11 = vld [vmem:[%s4705_s4 + $0x80] sm:$0xff] }
 0x1ae   : > { %2617 = vmatpush.bf16.msrb.mxu3 %v3754_v4 }
 0x1b0   : > { %v1081_v15 = vpop.f32.mrf.mxu0 }
 0x1b1   : > { %v1082_v16 = vadd.f32 %v4128_v37, %v1081_v15  ;;  %v1618_v15 = vmax.f32 %v1606_v7, %v1611_v14  ;;  %v3738_v7 = vld [vmem:[%s4705_s4 + $0x8] sm:$0xff] }
 0x1b2   : > { %2579 = vmatpush.bf16.msrb.mxu1 %v3738_v7  ;;  %2618 = vmatpush.bf16.msrb.mxu3 %v3753_v11 }
 0x1b3   : > { %v1314_v19 = vmax.f32 %v1082_v16, 0.0  ;;  %v1603_v16 = vld [vmem:[#allocation2 + $0x1e8] ss:$30 sm:$0xff] }
 0x1b4   : > { %v1608_v17 = vmax.f32 %v1596_v10, %v1603_v16  ;;  %v1665_v10 = vld [vmem:[#allocation2 + $0x2dd] ss:$30 sm:$0x3f]  ;;  %v1699_v16 = vld [vmem:[#allocation2 + $0x1f0] ss:$30 sm:$0xff] }
 0x1b5   : > { %1427 = vst [vmem:[#allocation2 + $0x110] sm:$0xff] %v1314_v19  ;;  %v1585_v19 = vmax.f32 %v1573_v13, %v1581_v18  ;;  %v1707_v13 = vld [vmem:[#allocation2 + $0x11] ss:$30 sm:$0xff] }
 0x1b7   : > { %v1597_v28 = vmax.f32 %v1585_v19, %v1593_v26  ;;  %v1719_v26 = vld [vmem:[#allocation2 + $0x12] ss:$30 sm:$0xff] }
 0x1b8   : > { %v1083_v22 = vpop.f32.mrf.mxu0 }
 0x1b9   : > { %v1084_v24 = vadd.f32 %v4128_v37, %v1083_v22  ;;  %v4329_v37 = vld [vmem:[%s4704_s3] ss:$0 sm:$0xff]  ;;  %v1630_v22 = vmax.f32 %v1618_v15, %v1623_v20  ;;  %v1609_v34 = vmax.f32 %v1597_v28, %v1605_v33  ;;  %v1689_v33 = vld [vmem:[#allocation2 + $0x2df] ss:$30 sm:$0x3f] }
 0x1ba   : > { %v3737_v20 = vld [vmem:[%s4705_s4] sm:$0xff] }
 0x1bb   : > { %v1315_v27 = vmax.f32 %v1084_v24, 0.0  ;;  %v1615_v24 = vld [vmem:[#allocation2 + $0x1e9] ss:$30 sm:$0xff]  ;;  %v1642_v30 = vmax.f32 %v1630_v22, %v1635_v29  ;;  %v1621_v44 = vmax.f32 %v1609_v34, %v1617_v42  ;;  %2580 = vmatpush.bf16.msrb.mxu1 %v3737_v20 }
 0x1bc   : > { %v1620_v25 = vmax.f32 %v1608_v17, %v1615_v24 }
 0x1bd   : > { %1428 = vst [vmem:[#allocation2 + $0x118] sm:$0xff] %v1315_v27  ;;  %v1633_v50 = vmax.f32 %v1621_v44, %v1629_v49  ;;  %v1701_v44 = vld [vmem:[#allocation2 + $0x2e0] ss:$30 sm:$0x3f] }
 0x1be   : > { %v1632_v32 = vmax.f32 %v1620_v25, %v1627_v31 }
 0x1c0   : > { %v1086_v35 = vpop.f32.mrf.mxu0 }
 0x1c1   : > { %v1087_v40 = vadd.f32 %v4329_v37, %v1086_v35  ;;  %v1647_v35 = vld [vmem:[#allocation2 + $0xc] ss:$30 sm:$0xff] }
 0x1c2   : > { %v1654_v38 = vmax.f32 %v1642_v30, %v1647_v35  ;;  %v1711_v30 = vld [vmem:[#allocation2 + $0x1f1] ss:$30 sm:$0xff] }
 0x1c3   : > { %v1316_v43 = vmax.f32 %v1087_v40, 0.0  ;;  %v1639_v40 = vld [vmem:[#allocation2 + $0x1eb] ss:$30 sm:$0xff] }
 0x1c4   : > { %v1644_v41 = vmax.f32 %v1632_v32, %v1639_v40  ;;  %v1666_v46 = vmax.f32 %v1654_v38, %v1659_v45 }
 0x1c5   : > { %1429 = vst [vmem:[#allocation2 + $0x120] sm:$0xff] %v1316_v43 }
 0x1c6   : > { %v1656_v48 = vmax.f32 %v1644_v41, %v1651_v47  ;;  %v1723_v41 = vld [vmem:[#allocation2 + $0x1f2] ss:$30 sm:$0xff] }
 0x1c7   : > { %v1743_v47 = vld [vmem:[#allocation2 + $0x14] ss:$30 sm:$0xff] }
 0x1c8   : > { %v1088_v53 = vpop.f32.mrf.mxu0 }
 0x1c9   : > { %v1089_v56 = vadd.f32 %v4329_v37, %v1088_v53  ;;  %v1678_v53 = vmax.f32 %v1666_v46, %v1671_v51  ;;  %v1735_v51 = vld [vmem:[#allocation2 + $0x1f3] ss:$30 sm:$0xff] }
 0x1cb   : > { %v1317_v59 = vmax.f32 %v1089_v56, 0.0  ;;  %v1668_v56 = vmax.f32 %v1656_v48, %v1663_v55  ;;  %v1690_v61 = vmax.f32 %v1678_v53, %v1683_v60 }
 0x1cd   : > { %1430 = vst [vmem:[#allocation2 + $0x128] sm:$0xff] %v1317_v59  ;;  %v1645_v59 = vmax.f32 %v1633_v50, %v1641_v57  ;;  %v1680_v63 = vmax.f32 %v1668_v56, %v1675_v62  ;;  %v1702_v5 = vmax.f32 %v1690_v61, %v1695_v1  ;;  %v1755_v57 = vld [vmem:[#allocation2 + $0x15] ss:$30 sm:$0xff]  ;;  %v1747_v61 = vld [vmem:[#allocation2 + $0x1f4] ss:$30 sm:$0xff] }
 0x1cf   : > { %v1657_v2 = vmax.f32 %v1645_v59, %v1653_v0  ;;  %v1714_v17 = vmax.f32 %v1702_v5, %v1707_v13  ;;  %v1725_v0 = vld [vmem:[#allocation2 + $0x2e2] ss:$30 sm:$0x3f]  ;;  %v1779_v13 = vld [vmem:[#allocation2 + $0x17] ss:$30 sm:$0xff] }
 0x1d0   : > { %v1091_v6 = vpop.f32.mrf.mxu0 }
 0x1d1   : > { %v1092_v8 = vadd.f32 %v4329_v37, %v1091_v6  ;;  %v1687_v6 = vld [vmem:[#allocation2 + $0x1ef] ss:$30 sm:$0xff]  ;;  %v1726_v28 = vmax.f32 %v1714_v17, %v1719_v26 }
 0x1d2   : > { %v1692_v9 = vmax.f32 %v1680_v63, %v1687_v6  ;;  %v1759_v6 = vld [vmem:[#allocation2 + $0x1f5] ss:$30 sm:$0xff] }
 0x1d3   : > { %v1318_v12 = vmax.f32 %v1092_v8, 0.0  ;;  %v3746_v8 = vld [vmem:[%s4705_s4 + $0x48] sm:$0xff] }
 0x1d4   : > { %v1704_v22 = vmax.f32 %v1692_v9, %v1699_v16  ;;  %v1737_v9 = vld [vmem:[#allocation2 + $0x2e3] ss:$30 sm:$0x3f]  ;;  %v1771_v16 = vld [vmem:[#allocation2 + $0x1f6] ss:$30 sm:$0xff] }
 0x1d5   : > { %1431 = vst [vmem:[#allocation2 + $0x130] sm:$0xff] %v1318_v12  ;;  %v1669_v12 = vmax.f32 %v1657_v2, %v1665_v10  ;;  %v1783_v26 = vld [vmem:[#allocation2 + $0x1f7] ss:$30 sm:$0xff] }
 0x1d6   : > { %v1716_v32 = vmax.f32 %v1704_v22, %v1711_v30 }
 0x1d8   : > { %v1093_v21 = vpop.f32.mrf.mxu0 }
 0x1d9   : > { %v1094_v23 = vadd.f32 %v4329_v37, %v1093_v21  ;;  %v3745_v21 = vld [vmem:[%s4705_s4 + $0x40] sm:$0xff] }
 0x1db   : > { %v1319_v27 = vmax.f32 %v1094_v23, 0.0  ;;  %v1677_v23 = vld [vmem:[#allocation2 + $0x2de] ss:$30 sm:$0x3f] }
 0x1dc   : > { %v1681_v25 = vmax.f32 %v1669_v12, %v1677_v23  ;;  %v1577_v42 = vld [vmem:[#allocation2 + $0xf6] ss:$30 sm:$0xff]  ;;  %v1589_v48 = vld [vmem:[#allocation2 + $0xf7] ss:$30 sm:$0xff] }
 0x1dd   : > { %1432 = vst [vmem:[#allocation2 + $0x138] sm:$0xff] %v1319_v27  ;;  %v1625_v62 = vld [vmem:[#allocation2 + $0xfa] ss:$30 sm:$0xff]  ;;  %v1637_v3 = vld [vmem:[#allocation2 + $0xfb] ss:$30 sm:$0xff] }
 0x1de   : > { %v1693_v35 = vmax.f32 %v1681_v25, %v1689_v33  ;;  %v1791_v23 = vld [vmem:[#allocation2 + $0x18] ss:$30 sm:$0xff]  ;;  %v1803_v33 = vld [vmem:[#allocation2 + $0x19] ss:$30 sm:$0xff] }
 0x1e0   : > { %v1096_v36 = vpop.f32.mrf.mxu0  ;;  %v1705_v46 = vmax.f32 %v1693_v35, %v1701_v44  ;;  %v1795_v35 = vld [vmem:[#allocation2 + $0x1f8] ss:$30 sm:$0xff] }
 0x1e1   : > { %v1097_v39 = vadd.f32 %v4329_v37, %v1096_v36  ;;  %v1731_v36 = vld [vmem:[#allocation2 + $0x13] ss:$30 sm:$0xff] }
 0x1e3   : > { %v1320_v43 = vmax.f32 %v1097_v39, 0.0  ;;  %v1738_v39 = vmax.f32 %v1726_v28, %v1731_v36 }
 0x1e4   : > { %v1649_v7 = vld [vmem:[#allocation2 + $0xfc] ss:$30 sm:$0xff]  ;;  %v1661_v12 = vld [vmem:[#allocation2 + $0xfd] ss:$30 sm:$0xff] }
 0x1e5   : > { %1433 = vst [vmem:[#allocation2 + $0x140] sm:$0xff] %v1320_v43  ;;  %v1728_v43 = vmax.f32 %v1716_v32, %v1723_v41  ;;  %v1750_v49 = vmax.f32 %v1738_v39, %v1743_v47  ;;  %v1673_v17 = vld [vmem:[#allocation2 + $0xfe] ss:$30 sm:$0xff]  ;;  %v1685_v22 = vld [vmem:[#allocation2 + $0xff] ss:$30 sm:$0xff] }
 0x1e6   : > { %v1709_v32 = vld [vmem:[#allocation2 + $0x101] ss:$30 sm:$0xff]  ;;  %v1773_v39 = vld [vmem:[#allocation2 + $0x2e6] ss:$30 sm:$0x3f] }
 0x1e7   : > { %v1740_v53 = vmax.f32 %v1728_v43, %v1735_v51  ;;  %v1762_v60 = vmax.f32 %v1750_v49, %v1755_v57  ;;  %v1733_v41 = vld [vmem:[#allocation2 + $0x103] ss:$30 sm:$0xff]  ;;  %v1815_v43 = vld [vmem:[#allocation2 + $0x1a] ss:$30 sm:$0xff] }
 0x1e8   : > { %v1098_v52 = vpop.f32.mrf.mxu0  ;;  %v3784_v47 = vld [vmem:[%s4705_s4 + $0x178] sm:$0xff] }
 0x1e9   : > { %v1099_v54 = vadd.f32 %v4329_v37, %v1098_v52  ;;  %v3747_v37 = vld [vmem:[%s4705_s4 + $0x50] sm:$0xff]  ;;  %v1752_v63 = vmax.f32 %v1740_v53, %v1747_v61  ;;  %2668 = vmatpush.bf16.msra.mxu3 %v3784_v47 }
 0x1ea   : > { %2597 = vmatpush.bf16.msrb.mxu2 %v3747_v37  ;;  %v1601_v52 = vld [vmem:[#allocation2 + $0xf8] ss:$30 sm:$0xff]  ;;  %v1807_v49 = vld [vmem:[#allocation2 + $0x1f9] ss:$30 sm:$0xff] }
 0x1eb   : > { %v1321_v58 = vmax.f32 %v1099_v54, 0.0  ;;  %v1713_v54 = vld [vmem:[#allocation2 + $0x2e1] ss:$30 sm:$0x3f]  ;;  %v1767_v37 = vld [vmem:[#allocation2 + $0x16] ss:$30 sm:$0xff] }
 0x1ec   : > { %v1717_v56 = vmax.f32 %v1705_v46, %v1713_v54  ;;  %v1774_v5 = vmax.f32 %v1762_v60, %v1767_v37  ;;  %v3776_v46 = vld [vmem:[%s4705_s4 + $0x138] sm:$0xff]  ;;  %v3775_v53 = vld [vmem:[%s4705_s4 + $0x130] sm:$0xff] }
 0x1ed   : > { %1434 = vst [vmem:[#allocation2 + $0x148] sm:$0xff] %v1321_v58  ;;  %v1613_v58 = vld [vmem:[#allocation2 + $0xf9] ss:$30 sm:$0xff]  ;;  %v1797_v37 = vld [vmem:[#allocation2 + $0x2e8] ss:$30 sm:$0x3f] }
 0x1ee   : > { %2598 = vmatpush.bf16.msrb.mxu2 %v3746_v8  ;;  %v1729_v2 = vmax.f32 %v1717_v56, %v1725_v0  ;;  %v1764_v8 = vmax.f32 %v1752_v63, %v1759_v6  ;;  %v3783_v54 = vld [vmem:[%s4705_s4 + $0x170] sm:$0xff]  ;;  %v3765_v6 = vld [vmem:[%s4705_s4 + $0xe0] sm:$0xff] }
 0x1ef   : > { %v1757_v60 = vld [vmem:[#allocation2 + $0x105] ss:$30 sm:$0xff]  ;;  %2669 = vmatpush.bf16.msra.mxu3 %v3783_v54 }
 0x1f0   : > { %v1741_v11 = vmax.f32 %v1729_v2, %v1737_v9  ;;  %v1827_v61 = vld [vmem:[#allocation2 + $0x1b] ss:$30 sm:$0xff]  ;;  %v1839_v9 = vld [vmem:[#allocation2 + $0x1c] ss:$30 sm:$0xff] }
 0x1f1   : > { %v3774_v2 = vld [vmem:[%s4705_s4 + $0x128] sm:$0xff] }
 0x1f2   : > { %2599 = vmatpush.bf16.msrb.mxu2 %v3745_v21 }
 0x1f4   : > { %v1509_v14 = vld [vmem:[#allocation2 + $0xf0] ss:$30 sm:$0xff]  ;;  %v1517_v15 = vld [vmem:[#allocation2 + $0xf1] ss:$30 sm:$0xff] }
 0x1f5   : > { %v1523_v18 = vmax.f32 %v1509_v14, %v1517_v15  ;;  %v1529_v19 = vld [vmem:[#allocation2 + $0xf2] ss:$30 sm:$0xff]  ;;  %v1541_v27 = vld [vmem:[#allocation2 + $0xf3] ss:$30 sm:$0xff]  ;;  %v1786_v15 = vmax.f32 %v1774_v5, %v1779_v13 }
 0x1f6   : > { %v1553_v31 = vld [vmem:[#allocation2 + $0xf4] ss:$30 sm:$0xff]  ;;  %v1565_v38 = vld [vmem:[#allocation2 + $0xf5] ss:$30 sm:$0xff]  ;;  %2649 = vmatpush.bf16.msra.mxu2 %v3776_v46 }
 0x1f7   : > { %v1535_v24 = vmax.f32 %v1523_v18, %v1529_v19  ;;  %v1776_v18 = vmax.f32 %v1764_v8, %v1771_v16  ;;  %v1749_v19 = vld [vmem:[#allocation2 + $0x2e4] ss:$30 sm:$0x3f]  ;;  %v1798_v25 = vmax.f32 %v1786_v15, %v1791_v23  ;;  %v1781_v8 = vld [vmem:[#allocation2 + $0x107] ss:$30 sm:$0xff] }
 0x1f8   : > { %v1753_v21 = vmax.f32 %v1741_v11, %v1749_v19  ;;  %v1793_v13 = vld [vmem:[#allocation2 + $0x108] ss:$30 sm:$0xff]  ;;  %v1809_v15 = vld [vmem:[#allocation2 + $0x2e9] ss:$30 sm:$0x3f] }
 0x1f9   : > { %v1547_v29 = vmax.f32 %v1535_v24, %v1541_v27  ;;  %v1697_v27 = vld [vmem:[#allocation2 + $0x100] ss:$30 sm:$0xff]  ;;  %v1788_v28 = vmax.f32 %v1776_v18, %v1783_v26  ;;  %v1853_v46 = vld [vmem:[#allocation2 + $0x10d] ss:$30 sm:$0xff] }
 0x1fa   : > { %2650 = vmatpush.bf16.msra.mxu2 %v3775_v53  ;;  %v1817_v26 = vld [vmem:[#allocation2 + $0x10a] ss:$30 sm:$0xff] }
 0x1fb   : > { %v1559_v34 = vmax.f32 %v1547_v29, %v1553_v31  ;;  %v1761_v29 = vld [vmem:[#allocation2 + $0x2e5] ss:$30 sm:$0x3f]  ;;  %v1800_v44 = vmax.f32 %v1788_v28, %v1795_v35 }
 0x1fc   : > { %v1765_v31 = vmax.f32 %v1753_v21, %v1761_v29  ;;  %v3781_v21 = vld [vmem:[%s4705_s4 + $0x160] sm:$0xff]  ;;  %v1855_v35 = vld [vmem:[#allocation2 + $0x1fd] ss:$30 sm:$0xff] }
 0x1fd   : > { %v1571_v40 = vmax.f32 %v1559_v34, %v1565_v38  ;;  %v3768_v34 = vld [vmem:[%s4705_s4 + $0xf8] sm:$0xff]  ;;  %v1810_v38 = vmax.f32 %v1798_v25, %v1803_v33  ;;  %v1812_v57 = vmax.f32 %v1800_v44, %v1807_v49 }
 0x1fe   : > { %2630 = vmatpush.bf16.msra.mxu1 %v3768_v34  ;;  %2651 = vmatpush.bf16.msra.mxu2 %v3774_v2  ;;  %v1843_v25 = vld [vmem:[#allocation2 + $0x1fc] ss:$30 sm:$0xff]  ;;  %v1829_v29 = vld [vmem:[#allocation2 + $0x10b] ss:$30 sm:$0xff] }
 0x1ff   : > { %v1583_v45 = vmax.f32 %v1571_v40, %v1577_v42  ;;  %v1721_v40 = vld [vmem:[#allocation2 + $0x102] ss:$30 sm:$0xff]  ;;  %v1822_v51 = vmax.f32 %v1810_v38, %v1815_v43 }
 0x200   : > { %v3780_v33 = vld [vmem:[%s4705_s4 + $0x158] sm:$0xff]  ;;  %v3763_v34 = vld [vmem:[%s4705_s4 + $0xd0] sm:$0xff]  ;;  %v3769_v2 = vld [vmem:[%s4705_s4 + $0x100] sm:$0xff] }
 0x201   : > { %v1595_v50 = vmax.f32 %v1583_v45, %v1589_v48  ;;  %v1777_v45 = vmax.f32 %v1765_v31, %v1773_v39  ;;  %v3767_v48 = vld [vmem:[%s4705_s4 + $0xf0] sm:$0xff]  ;;  %v1834_v0 = vmax.f32 %v1822_v51, %v1827_v61  ;;  %v1841_v39 = vld [vmem:[#allocation2 + $0x10c] ss:$30 sm:$0xff] }
 0x202   : > { %2631 = vmatpush.bf16.msra.mxu1 %v3767_v48  ;;  %v3770_v51 = vld [vmem:[%s4705_s4 + $0x108] sm:$0xff] }
 0x203   : > { %v1607_v55 = vmax.f32 %v1595_v50, %v1601_v52  ;;  %v1745_v52 = vld [vmem:[#allocation2 + $0x104] ss:$30 sm:$0xff]  ;;  %v1846_v11 = vmax.f32 %v1834_v0, %v1839_v9 }
 0x205   : > { %v1619_v59 = vmax.f32 %v1607_v55, %v1613_v58  ;;  %v1785_v55 = vld [vmem:[#allocation2 + $0x2e7] ss:$30 sm:$0x3f]  ;;  %v3766_v58 = vld [vmem:[%s4705_s4 + $0xe8] sm:$0xff] }
 0x206   : > { %2632 = vmatpush.bf16.msra.mxu1 %v3766_v58 }
 0x207   : > { %v1631_v1 = vmax.f32 %v1619_v59, %v1625_v62  ;;  %v1789_v59 = vmax.f32 %v1777_v45, %v1785_v55  ;;  %v1819_v62 = vld [vmem:[#allocation2 + $0x1fa] ss:$30 sm:$0xff] }
 0x208   : > { %v1824_v5 = vmax.f32 %v1812_v57, %v1819_v62  ;;  %v3762_v45 = vld [vmem:[%s4705_s4 + $0xc8] sm:$0xff] }
 0x209   : > { %v1643_v4 = vmax.f32 %v1631_v1, %v1637_v3  ;;  %v1769_v1 = vld [vmem:[#allocation2 + $0x106] ss:$30 sm:$0xff]  ;;  %v3782_v3 = vld [vmem:[%s4705_s4 + $0x168] sm:$0xff] }
 0x20a   : > { %2670 = vmatpush.bf16.msra.mxu3 %v3782_v3  ;;  %2633 = vmatpush.bf16.msra.mxu1 %v3765_v6  ;;  %v1845_v55 = vld [vmem:[#allocation2 + $0x2ec] ss:$30 sm:$0x3f]  ;;  %v1857_v6 = vld [vmem:[#allocation2 + $0x2ed] ss:$30 sm:$0x3f] }
 0x20b   : > { %v1655_v10 = vmax.f32 %v1643_v4, %v1649_v7  ;;  %v1801_v7 = vmax.f32 %v1789_v59, %v1797_v37 }
 0x20d   : > { %v1667_v14 = vmax.f32 %v1655_v10, %v1661_v12  ;;  %v1831_v12 = vld [vmem:[#allocation2 + $0x1fb] ss:$30 sm:$0xff]  ;;  %v1813_v19 = vmax.f32 %v1801_v7, %v1809_v15  ;;  %v3777_v7 = vld [vmem:[%s4705_s4 + $0x140] sm:$0xff] }
 0x20e   : > { %v1836_v18 = vmax.f32 %v1824_v5, %v1831_v12  ;;  %2671 = vmatpush.bf16.msra.mxu3 %v3781_v21  ;;  %v3791_v15 = vld [vmem:[%s4705_s4 + $0x1b0] sm:$0xff]  ;;  %v3790_v21 = vld [vmem:[%s4705_s4 + $0x1a8] sm:$0xff] }
 0x20f   : > { %v1679_v20 = vmax.f32 %v1667_v14, %v1673_v17  ;;  %v3773_v14 = vld [vmem:[%s4705_s4 + $0x120] sm:$0xff]  ;;  %v1851_v17 = vld [vmem:[#allocation2 + $0x1d] ss:$30 sm:$0xff] }
 0x210   : > { %2652 = vmatpush.bf16.msra.mxu2 %v3773_v14  ;;  %v3808_v14 = vld [vmem:[%s4705_s4 + $0x238] sm:$0xff] }
 0x211   : > { %v1691_v24 = vmax.f32 %v1679_v20, %v1685_v22  ;;  %v1805_v20 = vld [vmem:[#allocation2 + $0x109] ss:$30 sm:$0xff] }
 0x212   : > { %v3764_v22 = vld [vmem:[%s4705_s4 + $0xd8] sm:$0xff]  ;;  %2672 = vmatpush.bf16.msra.mxu3 %v3780_v33 }
 0x213   : > { %v1703_v30 = vmax.f32 %v1691_v24, %v1697_v27  ;;  %v1858_v24 = vmax.f32 %v1846_v11, %v1851_v17  ;;  %v1821_v27 = vld [vmem:[#allocation2 + $0x2ea] ss:$30 sm:$0x3f]  ;;  %2634 = vmatpush.bf16.msra.mxu1 %v3764_v22  ;;  %v3799_v17 = vld [vmem:[%s4705_s4 + $0x1f0] sm:$0xff] }
 0x214   : > { %v1825_v31 = vmax.f32 %v1813_v19, %v1821_v27  ;;  %v3806_v27 = vld [vmem:[%s4705_s4 + $0x228] sm:$0xff] }
 0x215   : > { %v1715_v36 = vmax.f32 %v1703_v30, %v1709_v32  ;;  %v1848_v30 = vmax.f32 %v1836_v18, %v1843_v25  ;;  %v3772_v32 = vld [vmem:[%s4705_s4 + $0x118] sm:$0xff]  ;;  %v1866_v38 = vrot.slane %v1858_v24, 4  ;;  %v3807_v18 = vld [vmem:[%s4705_s4 + $0x230] sm:$0xff] }
 0x216   : > { %2653 = vmatpush.bf16.msra.mxu2 %v3772_v32  ;;  %v3789_v32 = vld [vmem:[%s4705_s4 + $0x1a0] sm:$0xff] }
 0x217   : > { %v1727_v42 = vmax.f32 %v1715_v36, %v1721_v40  ;;  %v3771_v40 = vld [vmem:[%s4705_s4 + $0x110] sm:$0xff]  ;;  %v1860_v44 = vmax.f32 %v1848_v30, %v1855_v35  ;;  %2635 = vmatpush.bf16.msra.mxu1 %v3763_v34  ;;  %v4428_v49 = vsel %vm983_vm0, 0.0, %v1866_v38  ;;  %v3797_v35 = vld [vmem:[%s4705_s4 + $0x1e0] sm:$0xff] }
 0x218   : > { %v1883_v57 = vrot.slane %v4428_v49, 1  ;;  %v1895_v58 = vrot.slane %v4428_v49, 2  ;;  %v1962_v19 = vrot.slane %v4428_v49, 7 }
 0x219   : > { %v1739_v50 = vmax.f32 %v1727_v42, %v1733_v41  ;;  %v3779_v41 = vld [vmem:[%s4705_s4 + $0x150] sm:$0xff]  ;;  %v1833_v42 = vld [vmem:[#allocation2 + $0x2eb] ss:$30 sm:$0x3f]  ;;  %v1869_v54 = vrot.slane %v1860_v44, 4 }
 0x21a   : > { %v1837_v47 = vmax.f32 %v1825_v31, %v1833_v42  ;;  %2654 = vmatpush.bf16.msra.mxu2 %v3771_v40  ;;  %2673 = vmatpush.bf16.msra.mxu3 %v3779_v41  ;;  %v3788_v40 = vld [vmem:[%s4705_s4 + $0x198] sm:$0xff]  ;;  %v3787_v44 = vld [vmem:[%s4705_s4 + $0x190] sm:$0xff] }
 0x21b   : > { %v1751_v56 = vmax.f32 %v1739_v50, %v1745_v52  ;;  %v3778_v52 = vld [vmem:[%s4705_s4 + $0x148] sm:$0xff]  ;;  %2636 = vmatpush.bf16.msra.mxu1 %v3762_v45  ;;  %v3796_v42 = vld [vmem:[%s4705_s4 + $0x1d8] sm:$0xff]  ;;  %v3795_v45 = vld [vmem:[%s4705_s4 + $0x1d0] sm:$0xff]  ;;  %v1908_v50 = vrot.slane %v4428_v49, 3 }
 0x21c   : > { %v1849_v59 = vmax.f32 %v1837_v47, %v1845_v55  ;;  %v3802_v55 = vld [vmem:[%s4705_s4 + $0x208] sm:$0xff] }
 0x21d   : > { %v1763_v63 = vmax.f32 %v1751_v56, %v1757_v60  ;;  %v3761_v56 = vld [vmem:[%s4705_s4 + $0xc0] sm:$0xff] }
 0x21e   : > { %2655 = vmatpush.bf16.msra.mxu2 %v3770_v51  ;;  %2674 = vmatpush.bf16.msra.mxu3 %v3778_v52  ;;  %v1861_v11 = vmax.f32 %v1849_v59, %v1857_v6  ;;  %v3786_v51 = vld [vmem:[%s4705_s4 + $0x188] sm:$0xff]  ;;  %v3801_v6 = vld [vmem:[%s4705_s4 + $0x200] sm:$0xff] }
 0x21f   : > { %v1775_v4 = vmax.f32 %v1763_v63, %v1769_v1  ;;  %2637 = vmatpush.bf16.msra.mxu1 %v3761_v56 }
 0x221   : > { %v1787_v10 = vmax.f32 %v1775_v4, %v1781_v8  ;;  %v3792_v8 = vld [vmem:[%s4705_s4 + $0x1b8] sm:$0xff] }
 0x222   : > { %2656 = vmatpush.bf16.msra.mxu2 %v3769_v2  ;;  %2675 = vmatpush.bf16.msra.mxu3 %v3777_v7 }
 0x223   : > { %v1799_v16 = vmax.f32 %v1787_v10, %v1793_v13  ;;  %v3800_v13 = vld [vmem:[%s4705_s4 + $0x1f8] sm:$0xff] }
 0x225   : > { %v1811_v23 = vmax.f32 %v1799_v16, %v1805_v20  ;;  %v4482_v16 = vrot.slane %v1861_v11, 4 }
 0x227   : > { %v1823_v28 = vmax.f32 %v1811_v23, %v1817_v26  ;;  %v4501_v24 = vsel %vm983_vm0, %v1869_v54, %v4482_v16  ;;  %v3798_v26 = vld [vmem:[%s4705_s4 + $0x1e8] sm:$0xff] }
 0x228   : > { %v1888_v30 = vrot.slane %v4501_v24, 1  ;;  %v1900_v31 = vrot.slane %v4501_v24, 2 }
 0x229   : > { %v1835_v36 = vmax.f32 %v1823_v28, %v1829_v29 }
 0x22b   : > { %v1847_v43 = vmax.f32 %v1835_v36, %v1841_v39 }
 0x22d   : > { %v1859_v48 = vmax.f32 %v1847_v43, %v1853_v46  ;;  %v3804_v43 = vld [vmem:[%s4705_s4 + $0x218] sm:$0xff]  ;;  %v3803_v46 = vld [vmem:[%s4705_s4 + $0x210] sm:$0xff] }
 0x22f   : > { %v1867_v53 = vrot.slane %v1859_v48, 4 }
 0x231   : > { %v4447_v60 = vsel %vm983_vm0, %v1866_v38, %v1867_v53  ;;  %v4453_v61 = vsel %vm983_vm0, %v1867_v53, %v1869_v54  ;;  %v3794_v54 = vld [vmem:[%s4705_s4 + $0x1c8] sm:$0xff] }
 0x232   : > { %v3620_v62 = vpack.c.bf16 %v4447_v60, %v1866_v38  ;;  %v1884_v63 = vrot.slane %v4447_v60, 1  ;;  %v1886_v0 = vrot.slane %v4453_v61, 1  ;;  %v1896_v1 = vrot.slane %v4447_v60, 2  ;;  %v3805_v38 = vld [vmem:[%s4705_s4 + $0x220] sm:$0xff] }
 0x233   : > { %v1898_v3 = vrot.slane %v4453_v61, 2  ;;  %v1963_v20 = vrot.slane %v4447_v60, 7  ;;  %v1965_v23 = vrot.slane %v4453_v61, 7  ;;  %v1983_v25 = vpack.c.bf16 %v4453_v61, %v4447_v60 }
 0x234   : > { %3621 = vmatmul.msk.bf16.vlgmr.msrb.gmra.mxu1 %vm3619_vm4, %v3620_v62  ;;  %v1885_v37 = vsel %vm1882_vm5, %v1883_v57, %v1884_v63  ;;  %v1887_v4 = vsel %vm1882_vm5, %v1884_v63, %v1886_v0  ;;  %v1897_v5 = vsel %vm1894_vm6, %v1895_v58, %v1896_v1  ;;  %v1984_v33 = vpack.c.bf16 %v4501_v24, %v4453_v61 }
 0x235   : > { %v1976_v9 = vpack.c.bf16 %v1887_v4, %v1885_v37  ;;  %v1899_v10 = vsel %vm1894_vm6, %v1896_v1, %v1898_v3  ;;  %2687 = vmatpush.bf16.msrb.mxu1 %v3792_v8  ;;  %v4496_v22 = vsel %vm1961_vm7, %v1962_v19, %v1963_v20  ;;  %v4514_v28 = vsel %vm1961_vm7, %v1963_v20, %v1965_v23  ;;  %v3793_v37 = vld [vmem:[%s4705_s4 + $0x1c0] sm:$0xff] }
 0x236   : > { %v1977_v12 = vpack.c.bf16 %v1899_v10, %v1897_v5  ;;  %v1982_v29 = vpack.c.bf16 %v4514_v28, %v4496_v22  ;;  %v1889_v34 = vsel %vm1882_vm5, %v1886_v0, %v1888_v30  ;;  %v1901_v36 = vsel %vm1894_vm6, %v1898_v3, %v1900_v31  ;;  %v3785_v0 = vld [vmem:[%s4705_s4 + $0x180] sm:$0xff] }
 0x237   : > { %2600 = vmatmul.bf16.vlgmr.msrb.gmra.mxu2 %v1976_v9  ;;  %v1985_v39 = vpack.c.bf16 %v1888_v30, %v1889_v34  ;;  %v1986_v41 = vpack.c.bf16 %v1900_v31, %v1901_v36  ;;  %v1909_v47 = vrot.slane %v4447_v60, 3  ;;  %v1911_v48 = vrot.slane %v4453_v61, 3 }
 0x238   : > { %2619 = vmatmul.bf16.vlgmr.msrb.gmra.mxu3 %v1977_v12  ;;  %2706 = vmatpush.bf16.msrb.mxu2 %v3800_v13  ;;  %v1922_v52 = vrot.slane %v4447_v60, 4  ;;  %v1924_v53 = vrot.slane %v4453_v61, 4  ;;  %v1936_v58 = vrot.slane %v4447_v60, 5  ;;  %v1938_v59 = vrot.slane %v4453_v61, 5 }
 0x239   : > { %2725 = vmatpush.bf16.msrb.mxu3 %v3808_v14  ;;  %2688 = vmatpush.bf16.msrb.mxu1 %v3791_v15  ;;  %v1910_v56 = vsel %vm1907_vm8, %v1908_v50, %v1909_v47  ;;  %v1912_v57 = vsel %vm1907_vm8, %v1909_v47, %v1911_v48  ;;  %v1921_v62 = vrot.slane %v4428_v49, 4  ;;  %v1935_v63 = vrot.slane %v4428_v49, 5 }
 0x23a   : > { %v1978_v1 = vpack.c.bf16 %v1912_v57, %v1910_v56  ;;  %v1925_v3 = vsel %vm983_vm0, %v1922_v52, %v1924_v53  ;;  %v1939_v5 = vsel %vm1934_vm9, %v1936_v58, %v1938_v59  ;;  %v1880_v9 = vsel %vm1879_vm10, %v4482_v16, 0.0 }
 0x23b   : > { %v1923_v2 = vsel %vm983_vm0, %v1921_v62, %v1922_v52  ;;  %v1937_v4 = vsel %vm1934_vm9, %v1935_v63, %v1936_v58  ;;  %v1913_v10 = vrot.slane %v4501_v24, 3  ;;  %v1915_v11 = vrot.slane %v1880_v9, 3 }
 0x23c   : > { %2707 = vmatpush.bf16.msrb.mxu2 %v3799_v17  ;;  %v1979_v7 = vpack.c.bf16 %v1925_v3, %v1923_v2  ;;  %v1980_v8 = vpack.c.bf16 %v1939_v5, %v1937_v4  ;;  %v1926_v13 = vrot.slane %v4501_v24, 4  ;;  %v1928_v14 = vrot.slane %v1880_v9, 4 }
 0x23d   : > { %2726 = vmatpush.bf16.msrb.mxu3 %v3807_v18  ;;  %2689 = vmatpush.bf16.msrb.mxu1 %v3790_v21  ;;  %v1914_v12 = vsel %vm1907_vm8, %v1911_v48, %v1913_v10  ;;  %v1916_v15 = vsel %vm1907_vm8, %v1913_v10, %v1915_v11  ;;  %v1940_v17 = vrot.slane %v4501_v24, 5  ;;  %v1942_v18 = vrot.slane %v1880_v9, 5 }
 0x23e   : > { %v1987_v19 = vpack.c.bf16 %v1916_v15, %v1914_v12  ;;  %v1927_v20 = vsel %vm983_vm0, %v1924_v53, %v1926_v13  ;;  %v1948_v34 = vrot.slane %v4428_v49, 6  ;;  %v1967_v49 = vrot.slane %v4501_v24, 7  ;;  %v3812_v15 = vld [vmem:[%s4707_s6 + $0x18] sm:$0xff] }
 0x23f   : > { %v1941_v21 = vsel %vm1934_vm9, %v1938_v59, %v1940_v17  ;;  %v1943_v30 = vsel %vm1934_vm9, %v1940_v17, %v1942_v18  ;;  %vm2961_vm4 = vcmask 49152  }
 0x240   : > { %2708 = vmatpush.bf16.msrb.mxu2 %v3798_v26  ;;  %v1929_v26 = vsel %vm983_vm0, %v1926_v13, %v1928_v14  ;;  %v1989_v31 = vpack.c.bf16 %v1943_v30, %v1941_v21  ;;  %v1968_v22 = vsel %vm1961_vm7, %v1965_v23, %v1967_v49 }
 0x241   : > { %2727 = vmatpush.bf16.msrb.mxu3 %v3806_v27  ;;  %2690 = vmatpush.bf16.msrb.mxu1 %v3789_v32  ;;  %v1988_v27 = vpack.c.bf16 %v1929_v26, %v1927_v20  ;;  %v1949_v32 = vrot.slane %v4447_v60, 6 }
 0x244   : > { %2586 = vmatmul.bf16.gmra.mxu1 %v1984_v33  ;;  %2709 = vmatpush.bf16.msrb.mxu2 %v3797_v35  ;;  %v1951_v33 = vrot.slane %v4453_v61, 6  ;;  %v1950_v35 = vsel %vm1879_vm10, %v1948_v34, %v1949_v32 }
 0x245   : > { %2728 = vmatpush.bf16.msrb.mxu3 %v3805_v38  ;;  %2691 = vmatpush.bf16.msrb.mxu1 %v3788_v40  ;;  %v1955_v40 = vrot.slane %v1880_v9, 6 }
 0x246   : > { %v1952_v36 = vsel %vm1879_vm10, %v1949_v32, %v1951_v33  ;;  %v2781_v32 = vld [vmem:[%s397_s30] sm:$0x1]  ;;  %s2972_s30 = scalar_lea.hbm %s4712_s11, %s4017_s21 }
 0x247   : > { %2605 = vmatmul.bf16.gmra.mxu2 %v1985_v39  ;;  %v1981_v38 = vpack.c.bf16 %v1952_v36, %v1950_v35  ;;  %v1953_v39 = vrot.slane %v4501_v24, 6  ;;  %v2782_v34 = vpack.c.bf16 %v2781_v32, %v2781_v32  ;;  %s2976_s15 = sshll.u32 %s2972_s30, 4  ;;  %s2977_s15 = int_to_ptr.hbm [resolvable:$true] %s2976_s15 }
 0x248   : > { %2624 = vmatmul.bf16.gmra.mxu3 %v1986_v41  ;;  %2710 = vmatpush.bf16.msrb.mxu2 %v3796_v42  ;;  %v1969_v42 = vrot.slane %v1880_v9, 7  ;;  %s3884_s22 = sshra.s32 %s2977_s15, 4  ;;  %s3885_s22 = int_to_ptr.hbm [resolvable:$true] %s3884_s22 }
 0x249   : > { %2729 = vmatpush.bf16.msrb.mxu3 %v3804_v43  ;;  %2692 = vmatpush.bf16.msrb.mxu1 %v3787_v44  ;;  %v1954_v41 = vsel %vm1879_vm10, %v1951_v33, %v1953_v39  ;;  %v1956_v43 = vsel %vm1879_vm10, %v1953_v39, %v1955_v40  ;;  %s3886_s1 = scalar_lea.hbm %s3885_s22, 1  ;;  %p3891_p0 = scmp.lt.s32.totalorder %s3885_s22, %s4712_s11 }
 0x24a   : > { %v1990_v44 = vpack.c.bf16 %v1956_v43, %v1954_v41  ;;  %v1970_v28 = vsel %vm1961_vm7, %v1967_v49, %v1969_v42  ;;  %p3887_p11 = scmp.ne.s32.totalorder %s3885_s22, %s3886_s1  ;;  %p3892_p1 = scmp.lt.s32.totalorder %s3890_s29, %s3886_s1 }
 0x24b   : > { %v1991_v60 = vpack.c.bf16 %v1970_v28, %v1968_v22 }
 0x24c   : > { %2711 = vmatpush.bf16.msrb.mxu2 %v3795_v45  ;;  %p3888_p12 = pnand %p3887_p11, %p4034_p5  ;;  %p3893_p2 = por %p3892_p1, %p3891_p0 }
 0x24d   : > { %2730 = vmatpush.bf16.msrb.mxu3 %v3803_v46  ;;  %2693 = vmatpush.bf16.msrb.mxu1 %v3786_v51 }
 0x24e   : > { %p3889_p13 = pneg %p3888_p12 }
 0x250   : > { %2712 = vmatpush.bf16.msrb.mxu2 %v3794_v54  ;;  %p3894_p3 = pnand %p3893_p2, %p3889_p13 }
 0x251   : > { %2731 = vmatpush.bf16.msrb.mxu3 %v3802_v55  ;;  %2694 = vmatpush.bf16.msrb.mxu1 %v3785_v0 }
 0x254   : > { %2638 = vmatmul.bf16.vlgmr.msra.gmra.mxu1 %v1978_v1  ;;  %2713 = vmatpush.bf16.msrb.mxu2 %v3793_v37  ;;  %v3868_v1 = vld [vmem:[%s4706_s5] ss:$0 sm:$0xff] }
 0x255   : > { %2732 = vmatpush.bf16.msrb.mxu3 %v3801_v6 }
 0x257   : > { %2657 = vmatmul.bf16.vlgmr.msra.gmra.mxu2 %v1979_v7 }
 0x258   : > { %2676 = vmatmul.bf16.vlgmr.msra.gmra.mxu3 %v1980_v8 }
 0x259   : > { %2864 = vmatpush.bf16.msra.mxu3 %v3812_v15 }
 0x264   : > { %2643 = vmatmul.bf16.gmra.mxu1 %v1987_v19 }
 0x267   : > { %2662 = vmatmul.bf16.gmra.mxu2 %v1988_v27 }
 0x268   : > { %2681 = vmatmul.bf16.gmra.mxu3 %v1989_v31 }
 0x274   : > { %2695 = vmatmul.bf16.vlgmr.msrb.gmra.mxu1 %v1981_v38  ;;  %v3809_v38 = vld [vmem:[%s4707_s6] sm:$0xff] }
 0x277   : > { %2714 = vmatmul.bf16.vlgmr.msrb.gmra.mxu2 %v1982_v29 }
 0x278   : > { %2733 = vmatmul.bf16.vlgmr.msrb.gmra.mxu3 %v1983_v25  ;;  %v3623_v25 = vpack.c.bf16 %v4482_v16, %v4501_v24  ;;  %v3810_v16 = vld [vmem:[%s4707_s6 + $0x8] sm:$0xff]  ;;  %v2783_v24 = vld [vmem:[%s4708_s7] sm:$0xf] }
 0x279   : > { %v2822_v63 = vsel %vm983_vm0, %v2783_v24, 0  ;;  %2810 = vmatpush.bf16.msra.mxu1 %v3810_v16  ;;  %vm2761_vm0 = vcmask 257024  }
 0x27a   : > { %2831 = vmatpush.bf16.msra.mxu2 %v2822_v63 }
 0x27d   : > { %2811 = vmatpush.bf16.msra.mxu1 %v3809_v38 }
 0x284   : > { %2700 = vmatmul.bf16.gmra.mxu1 %v1990_v44 }
 0x287   : > { %2719 = vmatmul.bf16.gmra.mxu2 %v1991_v60 }
 0x288   : > { %3624 = vmatmul.msk.bf16.gmra.mxu3 %vm3622_vm11, %v3623_v25 }
 0x297   : > { %3634 = vmatmul.msk.bf16.vlgmr.msra.gmra.mxu2 %vm2817_vm12, %v2782_v34 }
 0x2b1   : > { %v2582_v29 = vpop.f32.mrf.mxu1 }
 0x2b2   : > { %v2583_v37 = vadd.f32 %v3868_v1, %v2582_v29 }
 0x2b9   : > { %v2584_v45 = vpop.f32.mrf.mxu1 }
 0x2ba   : > { %v2601_v46 = vpop.f32.mrf.mxu2  ;;  %v2585_v6 = vadd.f32 %v3868_v1, %v2584_v45 }
 0x2bb   : > { %v2620_v47 = vpop.f32.mrf.mxu3  ;;  %v2602_v5 = vadd.f32 %v2601_v46, %v2583_v37 }
 0x2bd   : > { %v2621_v7 = vadd.f32 %v2620_v47, %v2602_v5 }
 0x2c1   : > { %v2587_v48 = vpop.f32.mrf.mxu1 }
 0x2c2   : > { %v2603_v61 = vpop.f32.mrf.mxu2  ;;  %v2588_v17 = vadd.f32 %v3868_v1, %v2587_v48  ;;  %v3811_v48 = vld [vmem:[%s4707_s6 + $0x10] sm:$0xff] }
 0x2c3   : > { %v2622_v50 = vpop.f32.mrf.mxu3  ;;  %v2604_v10 = vadd.f32 %v2603_v61, %v2585_v6  ;;  %v3814_v61 = vld [vmem:[%s4707_s6 + $0x28] sm:$0xff]  ;;  %2865 = vmatpush.bf16.msra.mxu3 %v3811_v48 }
 0x2c4   : > { %2899 = vmatpush.bf16.msrb.mxu1 %v3814_v61 }
 0x2c5   : > { %v2623_v14 = vadd.f32 %v2622_v50, %v2604_v10 }
 0x2c9   : > { %v2589_v23 = vpop.f32.mrf.mxu1 }
 0x2ca   : > { %v2606_v51 = vpop.f32.mrf.mxu2  ;;  %v2590_v39 = vadd.f32 %v3868_v1, %v2589_v23 }
 0x2cb   : > { %v2625_v52 = vpop.f32.mrf.mxu3  ;;  %v2607_v26 = vadd.f32 %v2606_v51, %v2588_v17 }
 0x2cd   : > { %v2626_v35 = vadd.f32 %v2625_v52, %v2607_v26 }
 0x2d1   : > { %v2639_v53 = vpop.f32.mrf.mxu1 }
 0x2d2   : > { %v2608_v54 = vpop.f32.mrf.mxu2  ;;  %v2640_v11 = vadd.f32 %v2639_v53, %v2621_v7 }
 0x2d3   : > { %v2627_v55 = vpop.f32.mrf.mxu3  ;;  %v2609_v43 = vadd.f32 %v2608_v54, %v2590_v39  ;;  %v3818_v39 = vld [vmem:[%s4710_s9 + $0x18] sm:$0xff] }
 0x2d4   : > { %2952 = vmatpush.bf16.msrb.mxu2 %v3818_v39 }
 0x2d5   : > { %v2628_v45 = vadd.f32 %v2627_v55, %v2609_v43  ;;  %v3813_v55 = vld [vmem:[%s4707_s6 + $0x20] sm:$0xff] }
 0x2d6   : > { %2900 = vmatpush.bf16.msrb.mxu1 %v3813_v55  ;;  %v3815_v43 = vld [vmem:[%s4710_s9] sm:$0xff] }
 0x2d9   : > { %v2641_v56 = vpop.f32.mrf.mxu1 }
 0x2da   : > { %v2658_v57 = vpop.f32.mrf.mxu2  ;;  %v2642_v18 = vadd.f32 %v2641_v56, %v2623_v14 }
 0x2db   : > { %v2677_v58 = vpop.f32.mrf.mxu3  ;;  %v2659_v13 = vadd.f32 %v2658_v57, %v2640_v11 }
 0x2dd   : > { %v2678_v19 = vadd.f32 %v2677_v58, %v2659_v13 }
 0x2e1   : > { %v2644_v59 = vpop.f32.mrf.mxu1 }
 0x2e2   : > { %v2660_v62 = vpop.f32.mrf.mxu2  ;;  %v2645_v40 = vadd.f32 %v2644_v59, %v2626_v35 }
 0x2e3   : > { %v2679_v0 = vpop.f32.mrf.mxu3  ;;  %v2661_v27 = vadd.f32 %v2660_v62, %v2642_v18 }
 0x2e5   : > { %v2680_v36 = vadd.f32 %v2679_v0, %v2661_v27 }
 0x2e9   : > { %v2646_v2 = vpop.f32.mrf.mxu1 }
 0x2ea   : > { %v2663_v3 = vpop.f32.mrf.mxu2  ;;  %v2647_v50 = vadd.f32 %v2646_v2, %v2628_v45  ;;  %v2907_v45 = vld [vmem:[%s4709_s8] sm:$0x1] }
 0x2eb   : > { %v2682_v4 = vpop.f32.mrf.mxu3  ;;  %v2664_v44 = vadd.f32 %v2663_v3, %v2645_v40  ;;  %v3817_v40 = vld [vmem:[%s4710_s9 + $0x10] sm:$0xff] }
 0x2ec   : > { %2953 = vmatpush.bf16.msrb.mxu2 %v3817_v40 }
 0x2ed   : > { %v2683_v46 = vadd.f32 %v2682_v4, %v2664_v44 }
 0x2f1   : > { %v2696_v8 = vpop.f32.mrf.mxu1 }
 0x2f2   : > { %v2665_v9 = vpop.f32.mrf.mxu2  ;;  %v2697_v30 = vadd.f32 %v2696_v8, %v2678_v19 }
 0x2f3   : > { %v2684_v12 = vpop.f32.mrf.mxu3  ;;  %v2666_v56 = vadd.f32 %v2665_v9, %v2647_v50 }
 0x2f5   : > { %v2685_v63 = vadd.f32 %v2684_v12, %v2666_v56 }
 0x2f9   : > { %v2698_v20 = vpop.f32.mrf.mxu1 }
 0x2fa   : > { %v2715_v21 = vpop.f32.mrf.mxu2  ;;  %v2699_v41 = vadd.f32 %v2698_v20, %v2680_v36 }
 0x2fb   : > { %v2734_v31 = vpop.f32.mrf.mxu3  ;;  %v2716_v33 = vadd.f32 %v2715_v21, %v2697_v30 }
 0x2fd   : > { %v2735_v49 = vadd.f32 %v2734_v31, %v2716_v33 }
 0x2ff   : > { %v2744_v25 = vmax.f32 %v2735_v49, 0.0 }
 0x301   : > { %v2701_v60 = vpop.f32.mrf.mxu1  ;;  %v2749_v23 = vsel %vm2748_vm13, %v2744_v25, -inf }
 0x302   : > { %v2717_v42 = vpop.f32.mrf.mxu2  ;;  %v2702_v51 = vadd.f32 %v2701_v60, %v2683_v46 }
 0x303   : > { %v2718_v22 = vadd.f32 %v2717_v42, %v2699_v41  ;;  %v2736_v28 = vpop.f32.mrf.mxu3  ;;  %v3816_v42 = vld [vmem:[%s4710_s9 + $0x8] sm:$0xff] }
 0x304   : > { %2954 = vmatpush.bf16.msrb.mxu2 %v3816_v42 }
 0x305   : > { %v2737_v29 = vadd.f32 %v2736_v28, %v2718_v22 }
 0x307   : > { %v2745_v47 = vmax.f32 %v2737_v29, 0.0 }
 0x308   : > { %2955 = vmatpush.bf16.msrb.mxu2 %v3815_v43 }
 0x309   : > { %v2751_v52 = vsel %vm2750_vm14, %v2745_v47, -inf  ;;  %v2703_v62 = vpop.f32.mrf.mxu1  ;;  %v2760_v2 = vsel %vm2759_vm15, %v2745_v47, -inf }
 0x30a   : > { %v2752_v53 = vmax.f32 %v2749_v23, %v2751_v52  ;;  %v2720_v54 = vpop.f32.mrf.mxu2  ;;  %v2704_v3 = vadd.f32 %v2703_v62, %v2685_v63 }
 0x30b   : > { %v2721_v57 = vadd.f32 %v2720_v54, %v2702_v51  ;;  %v2739_v58 = vpop.f32.mrf.mxu3  ;;  %v2919_v51 = vld [vmem:[%s4711_s10] sm:$0x1] }
 0x30c   : > { %v2753_v59 = vrot.slane %v2752_v53, 4 }
 0x30d   : > { %v2740_v16 = vadd.f32 %v2739_v58, %v2721_v57 }
 0x30e   : > { %v2754_v24 = vmax.f32 %v2752_v53, %v2753_v59 }
 0x30f   : > { %v2746_v0 = vmax.f32 %v2740_v16, 0.0 }
 0x310   : > { %v2755_v1 = vrot.slane %v2754_v24, 2 }
 0x311   : > { %v2762_v37 = vsel %vm2761_vm0, %v2746_v0, -inf  ;;  %v2771_v18 = vsel %vm2770_vm1, %v2746_v0, -inf }
 0x312   : > { %v2756_v4 = vmax.f32 %v2754_v24, %v2755_v1  ;;  %v2763_v5 = vmax.f32 %v2760_v2, %v2762_v37  ;;  %v2722_v6 = vpop.f32.mrf.mxu2 }
 0x313   : > { %v2723_v7 = vadd.f32 %v2722_v6, %v2704_v3  ;;  %v2741_v10 = vpop.f32.mrf.mxu3 }
 0x314   : > { %v2757_v8 = vrot.slane %v2756_v4, 1  ;;  %v2764_v9 = vrot.slane %v2763_v5, 4 }
 0x315   : > { %v2742_v11 = vadd.f32 %v2741_v10, %v2723_v7 }
 0x316   : > { %v2758_v13 = vmax.f32 %v2756_v4, %v2757_v8  ;;  %v2765_v14 = vmax.f32 %v2763_v5, %v2764_v9 }
 0x317   : > { %v2747_v15 = vmax.f32 %v2742_v11, 0.0 }
 0x318   : > { %v2784_v17 = vpack.c.bf16 %v2758_v13, %v2758_v13  ;;  %v2766_v12 = vrot.slane %v2765_v14, 2 }
 0x319   : > { %v2773_v19 = vsel %vm2772_vm2, %v2747_v15, -inf }
 0x31a   : > { %v2767_v20 = vmax.f32 %v2765_v14, %v2766_v12  ;;  %v2774_v21 = vmax.f32 %v2771_v18, %v2773_v19  ;;  %3633 = vmatmul.msk.bf16.vlgmr.msra.gmra.mxu1 %vm2748_vm13, %v2784_v17  ;;  %v2833_v41 = vpop.f32.mrf.mxu2 }
 0x31c   : > { %v2768_v26 = vrot.slane %v2767_v20, 1  ;;  %v2775_v27 = vrot.slane %v2774_v21, 4 }
 0x31e   : > { %v2769_v30 = vmax.f32 %v2767_v20, %v2768_v26  ;;  %v2776_v31 = vmax.f32 %v2774_v21, %v2775_v27 }
 0x320   : > { %v2837_v32 = vpack.c.bf16 %v2769_v30, %v2769_v30  ;;  %v2777_v33 = vrot.slane %v2776_v31, 2 }
 0x322   : > { %v2778_v34 = vmax.f32 %v2776_v31, %v2777_v33  ;;  %3647 = vmatmul.msk.bf16.vlgmr.msra.gmra.mxu3 %vm2748_vm13, %v2837_v32  ;;  %v2835_v49 = vpop.f32.mrf.mxu2 }
 0x324   : > { %v2779_v35 = vrot.slane %v2778_v34, 1 }
 0x326   : > { %v2780_v36 = vmax.f32 %v2778_v34, %v2779_v35 }
 0x328   : > { %v2872_v38 = vpack.c.bf16 %v2780_v36, %v2780_v36 }
 0x32a   : > { %3660 = vmatmul.msk.bf16.vlgmr.msrb.gmra.mxu1 %vm2748_vm13, %v2872_v38 }
 0x397   : > { %v2813_v44 = vpop.f32.mrf.mxu1 }
 0x398   : > { %v2834_v28 = vadd.f32 %v2833_v41, %v2813_v44 }
 0x39f   : > { %v2815_v22 = vpop.f32.mrf.mxu1 }
 0x3a5   : > { %v2867_v60 = vpop.f32.mrf.mxu3 }
 0x3a6   : > { %v2871_v25 = vadd.f32 %v2867_v60, %v2834_v28 }
 0x3a7   : > { %v2902_v29 = vpop.f32.mrf.mxu1 }
 0x3a8   : > { %v2906_v46 = vadd.f32 %v2902_v29, %v2871_v25 }
 0x3aa   : > { %v2908_v47 = vadd.f32 %v2907_v45, %v2906_v46 }
 0x3ac   : > { %v2909_v48 = vmax.f32 %v2908_v47, 0.0 }
 0x3ad   : > { %v2869_v61 = vpop.f32.mrf.mxu3 }
 0x3ae   : > { %v2910_v50 = vpack.c.bf16 %v2909_v48, %v2909_v48 }
 0x3af   : > { %v2904_v23 = vpop.f32.mrf.mxu1 }
 0x3b0   : > { %3677 = vmatmul.msk.bf16.vlgmr.msrb.gmra.mxu2 %vm2944_vm3, %v2910_v50 }
 0x433   : > { %v2957_v52 = vpop.f32.mrf.mxu2 }
 0x434   : > { %v2958_v53 = vadd.f32 %v2957_v52, %v2919_v51 }
 0x436   : > { %2962 = vst.msk [vmem:[%s389_s12] sm:$0x1] %vm2961_vm4, %v2958_v53 }
 0x437   : > { %3897 = shalt.err (!%p3894_p3)
}
 0x438   : > { %3826 = dma.vmem_to_hbm [thread:$0]  (%p4034_p5), %s2975_s14, 16, %s2977_s15, %s2964_s16  }
 0x43b   : > { %v2959_v54 = vpop.f32.mrf.mxu2 }
 0x43c PF: > { %p3832_p4 = scmp.ge.s32.totalorder %s3932_s20, 2  ;;  %s2988_s24 = sand.u32 1, %s3920_s17  }
 0x43d   : > { %s2989_s13 = scalar_lea.sflag [#allocation4], %s2988_s24 }
 0x43e   : > { %p3829_p7 = pnand %p3832_p4, %p4038_p6 }
 0x440   : > { %p3830_p8 = pneg %p3829_p7 }
 0x442   : > { %3915 = dma.done.wait (%p3830_p8), %s2989_s13, 16  }
 0x443   : > { %3917 = vsyncadd (%p3830_p8), %s2989_s13, 4294967280  ;;  %p21_p9 = scmp.ge.s32.totalorder %s4021_s23, 4   ;;  %s4721_s17 = smov %s3924_s18 }
 0x444   : > { %s4722_s18 = smov %s3928_s19  ;;  %s4723_s19 = smov %s4032_s26 }
 0x445   : > { %s4724_s20 = smov %s4021_s23  ;;  %23 = sbr.rel (!%p21_p9) target bundleno = 6 (0x6), region = 223 }
 0x44a   :  { %2994 = vsyncpa [#allocation4], 1 }
 0x44b   :  { %2996 = vsyncpa [#allocation4 + $0x1], 1 }

</bundles_post_ra>
